<compile_context>
chip_gen: v6e
topology: v6e:2x2x1
jax: 0.10.0
libtpu: 0.0.40
codegen_flags: <defaults>
</compile_context>

<pallas_src>
import jax
import jax.numpy as jnp
from jax import lax
from jax.experimental import pallas as pl
from jax.experimental.pallas import tpu as pltpu  # noqa: F401


# ----------------------------------------------------------------------------
# Packing layout constants
# ----------------------------------------------------------------------------
LANES = 128          # lane width of every packed slab / in-kernel feature tensor
PAD = 128            # padded rows per weight matrix in the parameter slab
PBLK = PAD + 8       # rows per (W, b) parameter block (bias lives in row PAD)
QCOL = 0             # query form  [x, y, z, 1, |p|^2]                cols 0:5
TCOL = 8             # target form [-2x, -2y, -2z, |p|^2, 1]          cols 8:13
TCOL_M = 16          # target form with +BIG on |p|^2 for masked-out points
MASK_COL = 24        # query-mask column (1.0 valid / 0.0 invalid)
BIG = 1e30           # penalty added to masked target distances


def _round_up(x, m):
    return -(-x // m) * m


def _spec(shape):
    """Full-array BlockSpec for an empty grid."""
    nd = len(shape)
    return pl.BlockSpec(shape, lambda *_, _nd=nd: (0,) * _nd)


# ----------------------------------------------------------------------------
# Host-side operand packing (3 lane-dense slabs)
# ----------------------------------------------------------------------------
def _pack_inputs(params, points, feats, masks):
    L = len(points)
    f32 = jnp.float32

    # per-level row offsets (8-aligned), shared by the geometry & feature slabs
    offs, row = [], 0
    for l in range(L):
        offs.append(row)
        row += _round_up(points[l].shape[0], 8)
    total_rows = row

    geom = jnp.zeros((total_rows, LANES), f32)
    fslab = jnp.zeros((total_rows, LANES), f32)
    for l in range(L):
        p = points[l].astype(f32)
        n = p.shape[0]
        o = offs[l]
        sq = jnp.sum(p * p, axis=1, keepdims=True)
        one = jnp.ones((n, 1), f32)
        m = masks[l]
        mcol = one if m is None else m.astype(f32).reshape(n, 1)
        # query form: d2[i,j] = Q[i] . T[j] with Q = [x,y,z,1,|q|^2]
        geom = geom.at[o:o + n, QCOL:QCOL + 3].set(p)
        geom = geom.at[o:o + n, QCOL + 3:QCOL + 4].set(one)
        geom = geom.at[o:o + n, QCOL + 4:QCOL + 5].set(sq)
        # target form (unmasked): T = [-2x,-2y,-2z,|t|^2,1]
        geom = geom.at[o:o + n, TCOL:TCOL + 3].set(-2.0 * p)
        geom = geom.at[o:o + n, TCOL + 3:TCOL + 4].set(sq)
        geom = geom.at[o:o + n, TCOL + 4:TCOL + 5].set(one)
        # target form (masked): |t|^2 + BIG for invalid points -> never nearest,
        # never inside the radius (equivalent to the previous where(mask, d2, BIG))
        geom = geom.at[o:o + n, TCOL_M:TCOL_M + 3].set(-2.0 * p)
        geom = geom.at[o:o + n, TCOL_M + 3:TCOL_M + 4].set(sq + BIG * (1.0 - mcol))
        geom = geom.at[o:o + n, TCOL_M + 4:TCOL_M + 5].set(one)
        geom = geom.at[o:o + n, MASK_COL:MASK_COL + 1].set(mcol)

        f = feats[l].astype(f32)
        c = f.shape[1]
        assert c <= LANES
        fslab = fslab.at[o:o + n, :c].set(f)

    # parameter slab: one PBLK-row block per (W, b), zero-padded to 128x128 so
    # the whole feature chain can run at a constant 128-lane width
    blocks, p_off, cur = [], {}, 0

    def add(name, w, b):
        nonlocal cur
        w = jnp.asarray(w, f32)
        b = jnp.asarray(b, f32).reshape(1, -1)
        assert w.shape[0] <= PAD and w.shape[1] <= LANES
        blk = jnp.zeros((PBLK, LANES), f32)
        blk = blk.at[:w.shape[0], :w.shape[1]].set(w)
        blk = blk.at[PAD:PAD + 1, :b.shape[1]].set(b)
        blocks.append(blk)
        p_off[name] = cur
        cur += PBLK

    for l in range(L):
        add(("up", l), params["up"][l]["w"], params["up"][l]["b"])
        add(("lin", l), params["lin"][l]["w"], params["lin"][l]["b"])
    for i, layer in enumerate(params["mlp"]):
        add(("mlp", i), layer["w"], layer["b"])
    pslab = jnp.concatenate(blocks, axis=0)
    return geom, fslab, pslab, offs, p_off


# ----------------------------------------------------------------------------
# Fused decoder forward (single pallas_call)
# ----------------------------------------------------------------------------
def decoder_forward(params, points, feats, masks, feature_matmul_dtype=jnp.float32):
    """feature_matmul_dtype: set to jnp.bfloat16 on v6e/v7x for MXU throughput at
    large N/C (distances always stay f32); default f32 for exact numerics."""
    L = len(points)
    assert L >= 2

    geom, fslab, pslab, offs, p_off = _pack_inputs(params, points, feats, masks)
    n_lvl = [p.shape[0] for p in points]

    def mask_applies(mask_lvl, n):
        # Reproduces the reference behaviour for q_mask=None and for mask/point
        # length mismatches (query_mask=masks[-1] with points[-2] queries, etc.).
        # When it applies, the requested mask is the data level's own mask, which
        # is exactly what the slabs bake (levels have distinct point counts).
        if mask_lvl is None:
            return False
        m = masks[mask_lvl]
        return (m is not None) and (m.shape[0] == n)

    plan = []

    def record(q_lvl, t_lvl, tf_from_feats, up_l, q_mask, t_mask, src_mask,
               query_mask, skip):
        nq, nt = n_lvl[q_lvl], n_lvl[t_lvl]
        tm, sm = mask_applies(t_mask, nt), mask_applies(src_mask, nt)
        # In the reference forward, up_knn's t_mask and GridSampleConv's src_mask
        # are always the same mask -> fold it once into the distance matrix.
        assert tm == sm
        plan.append(dict(
            q_off=offs[q_lvl], nq=nq, t_off=offs[t_lvl], nt=nt,
            tcol=TCOL_M if tm else TCOL,
            uk_qm=mask_applies(q_mask, nq),
            gc_qm=mask_applies(query_mask, nq),
            tf_off=offs[t_lvl] if tf_from_feats else None,
            r2=float(params["up"][up_l]["radius"]) ** 2,
            up=p_off[("up", up_l)],
            skip=skip))

    # coarsest level: fe = up[-1](up_knn(...)) + feats[-2]
    record(L - 2, L - 1, True, L - 1, L - 2, L - 1, L - 1, L - 1,
           ("raw", offs[L - 2]))
    pe = L - 2
    for layer_n in range(L - 2, 0, -1):
        record(layer_n, pe, False, layer_n, layer_n, layer_n + 1, layer_n + 1,
               layer_n, ("lin", offs[layer_n], p_off[("lin", layer_n)]))
        pe = layer_n
    record(0, pe, False, 0, None, 0, 0, None,
           ("lin", offs[0], p_off[("lin", 0)]))

    mlp_offs = [p_off[("mlp", i)] for i in range(len(params["mlp"]))]
    out_c = params["mlp"][-1]["w"].shape[1]
    n0 = n_lvl[0]
    fmm = feature_matmul_dtype

    def kernel(geom_ref, feat_ref, par_ref, o_ref):
        dn = (((1,), (1,)), ((), ()))

        def weight(o):
            return par_ref[pl.ds(o, PAD), :]            # [128, 128], zero-padded

        def bias(o):
            return par_ref[pl.ds(o + PAD, 1), :]        # [1, 128], zero-padded

        def fmatmul(a, b):
            return jnp.dot(a.astype(fmm), b.astype(fmm),
                           preferred_element_type=jnp.float32)

        fe = None
        for rec in plan:
            nq, nt = rec["nq"], rec["nt"]
            qrows = geom_ref[pl.ds(rec["q_off"], nq), :]          # [nq, 128]
            trows = qrows if rec["t_off"] == rec["q_off"] else \
                geom_ref[pl.ds(rec["t_off"], nt), :]              # [nt, 128]

            # Masked pairwise squared distances in a single MXU push:
            #   Q = [x,y,z,1,|q|^2,0..], T = [-2x,-2y,-2z,|t|^2(+BIG if masked),1,0..]
            d2 = lax.dot_general(qrows[:, QCOL:QCOL + 8],
                                 trows[:, rec["tcol"]:rec["tcol"] + 8],
                                 dn, preferred_element_type=jnp.float32)  # [nq, nt]

            # UpsampleBlock: one-hot row selecting the nearest valid target per
            # query (first index on ties; all-masked rows fall back to column 0,
            # matching the previous kernel's behaviour).
            col = lax.broadcasted_iota(jnp.int32, (nq, nt), 1)
            minv = jnp.min(d2, axis=1, keepdims=True)
            first = jnp.min(jnp.where(d2 <= minv, col, nt), axis=1, keepdims=True)
            w = (col == first).astype(jnp.float32)
            if rec["uk_qm"]:
                w = w * qrows[:, MASK_COL:MASK_COL + 1]

            # GridSampleConv aggregation: masked radius mean, folded into the same
            # [nq, nt] weight matrix so the feature gather is a single matmul.
            # TODO(synk): GridSampleConv internals are not given in the reference;
            # implemented as masked radius-mean aggregation + preactivated linear.
            neigh = (d2 <= rec["r2"]).astype(jnp.float32)
            cnt = jnp.maximum(jnp.sum(neigh, axis=1, keepdims=True), 1.0)
            w = w + neigh * pl.reciprocal(cnt, approx=True)

            sf = fe if rec["tf_off"] is None else feat_ref[pl.ds(rec["tf_off"], nt), :]
            pre = jnp.maximum(fmatmul(w, sf), 0.0)
            fe_new = fmatmul(pre, weight(rec["up"])) + bias(rec["up"])
            if rec["gc_qm"]:
                fe_new = fe_new * qrows[:, MASK_COL:MASK_COL + 1]

            # skip-connection epilogue (residual add / skip linear), fused in.
            sk = rec["skip"]
            skip_f = feat_ref[pl.ds(sk[1], nq), :]
            if sk[0] == "raw":
                fe = fe_new + skip_f
            else:
                fe = fe_new + fmatmul(skip_f, weight(sk[2])) + bias(sk[2])

        # DecreasingMLP head, chained in-register at a constant 128-lane width
        # (pos_enc=False, enable_dropout=False in this configuration).
        h = fe
        for i, o in enumerate(mlp_offs):
            h = fmatmul(h, weight(o)) + bias(o)
            if i < len(mlp_offs) - 1:
                h = jnp.maximum(h, 0.0)
        o_ref[...] = h.astype(o_ref.dtype)

    out = pl.pallas_call(
        kernel,
        out_shape=jax.ShapeDtypeStruct((n0, LANES), jnp.float32),
        in_specs=[_spec(geom.shape), _spec(fslab.shape), _spec(pslab.shape)],
        out_specs=_spec((n0, LANES)),
    )(geom, fslab, pslab)
    # lane-dense store inside the kernel; slice to the real output width here.
    return out[:, :out_c]


# ----------------------------------------------------------------------------
# Parameter construction (deterministic, synthetic)
# ----------------------------------------------------------------------------
def _mlp_dims(n_layers, in_dim, out_dim):
    # TODO(synk): DecreasingMLP internals are not given in the reference; widths
    # interpolated linearly and hidden widths rounded up to multiples of 8.
    dims = [in_dim]
    for i in range(1, n_layers):
        d = in_dim + (out_dim - in_dim) * i / n_layers
        dims.append(_round_up(max(int(round(d)), 1), 8))
    dims.append(out_dim)
    return dims


def init_decoder_params(key, num_enc_layers, in_dims, out_dim, output_size, radii):
    k_lin, k_up, k_mlp = jax.random.split(key, 3)
    lin = []
    for l in range(num_enc_layers):
        kw, kb = jax.random.split(jax.random.fold_in(k_lin, l))
        lin.append({"w": 0.1 * jax.random.normal(kw, (in_dims[l], out_dim), jnp.float32),
                    "b": 0.01 * jax.random.normal(kb, (1, out_dim), jnp.float32)})
    up = []
    for l in range(num_enc_layers):
        kw, kb = jax.random.split(jax.random.fold_in(k_up, l))
        up.append({"w": 0.1 * jax.random.normal(kw, (out_dim, out_dim), jnp.float32),
                   "b": 0.01 * jax.random.normal(kb, (1, out_dim), jnp.float32),
                   "radius": radii[l]})
    dims = _mlp_dims(4, out_dim, output_size)
    mlp = []
    for i in range(4):
        kw, kb = jax.random.split(jax.random.fold_in(k_mlp, i))
        mlp.append({"w": 0.1 * jax.random.normal(kw, (dims[i], dims[i + 1]), jnp.float32),
                    "b": 0.01 * jax.random.normal(kb, (1, dims[i + 1]), jnp.float32)})
    return {"lin": lin, "up": up, "mlp": mlp}


# ----------------------------------------------------------------------------
if __name__ == "__main__":
    key = jax.random.PRNGKey(0)

    num_enc_layers = 3
    out_dim = 32
    output_size = 4
    # in_dims[-1] and in_dims[-2] must equal out_dim for the residual adds to
    # typecheck (the reference adds feats[-2] directly and feeds feats[-1] into a
    # conv with in_fdim=out_dim).
    in_dims = [16, 32, 32]
    layer_kernel_radii = [0.5, 1.0, 2.0]
    npts = [64, 32, 16]     # points per pyramid level (finest -> coarsest)

    keys = jax.random.split(key, 16)
    points = [jax.random.normal(keys[i], (npts[i], 3), jnp.float32)
              for i in range(num_enc_layers)]
    feats = [0.1 * jax.random.normal(keys[4 + i], (npts[i], in_dims[i]), jnp.float32)
             for i in range(num_enc_layers)]
    masks = [jnp.arange(npts[i]) < (npts[i] - 2) for i in range(num_enc_layers)]

    params = init_decoder_params(keys[10], num_enc_layers, in_dims, out_dim,
                                 output_size, layer_kernel_radii)

    out = decoder_forward(params, points, feats, masks)
    out = jax.block_until_ready(out)
    assert out.shape == (npts[0], output_size)
    assert out.dtype == jnp.float32
    assert bool(jnp.all(jnp.isfinite(out)))
    print("KERNEL_OK")
</pallas_src>

<mosaic_0001>
module attributes {stable_mosaic.version = 11 : i64} {
  func.func @kernel(%arg0: memref<112x128xf32, #tpu.memory_space<vmem>>, %arg1: memref<112x128xf32, #tpu.memory_space<vmem>>, %arg2: memref<1360x128xf32, #tpu.memory_space<vmem>>, %arg3: memref<64x128xf32, #tpu.memory_space<vmem>>) attributes {dimension_semantics = [], scalar_prefetch = 0 : i64, scratch_operands = 0 : i64, tpu.core_type = #tpu.core_type<tc>} {
    %c64 = arith.constant 64 : index
    %c0 = arith.constant 0 : index
    %0 = vector.load %arg0[%c64, %c0] : memref<112x128xf32, #tpu.memory_space<vmem>>, vector<32x128xf32>
    %c96 = arith.constant 96 : index
    %c0_0 = arith.constant 0 : index
    %1 = vector.load %arg0[%c96, %c0_0] : memref<112x128xf32, #tpu.memory_space<vmem>>, vector<16x128xf32>
    %2 = vector.extract_strided_slice %0 {offsets = [0, 0], sizes = [32, 8], strides = [1, 1]} : vector<32x128xf32> to vector<32x8xf32>
    %3 = vector.extract_strided_slice %1 {offsets = [0, 16], sizes = [16, 8], strides = [1, 1]} : vector<16x128xf32> to vector<16x8xf32>
    %cst = arith.constant dense<0.000000e+00> : vector<32x16xf32>
    %4 = tpu.matmul %2, %3, %cst {dimension_numbers = #tpu.dot_dimension_numbers<[1], [1], [0], [0], [0, 0, 1, 0], [], []>} : vector<32x8xf32>, vector<16x8xf32>, vector<32x16xf32> -> vector<32x16xf32>
    %5 = tpu.iota {dimensions = array<i32: 1>} : vector<32x16xi32>
    %cst_1 = arith.constant dense<0x7F800000> : vector<32xf32>
    %6 = vector.multi_reduction <minimumf>, %4, %cst_1 [1] : vector<32x16xf32> to vector<32xf32>
    %7 = vector.shape_cast %6 : vector<32xf32> to vector<32x1xf32>
    %8 = vector.broadcast %7 : vector<32x1xf32> to vector<32x16xf32>
    %9 = arith.cmpf ole, %4, %8 : vector<32x16xf32>
    %c16_i32 = arith.constant 16 : i32
    %10 = vector.broadcast %c16_i32 : i32 to vector<32x16xi32>
    %11 = arith.select %9, %5, %10 : vector<32x16xi1>, vector<32x16xi32>
    %cst_2 = arith.constant dense<2147483647> : vector<32xi32>
    %12 = vector.multi_reduction <minsi>, %11, %cst_2 [1] : vector<32x16xi32> to vector<32xi32>
    %13 = vector.shape_cast %12 : vector<32xi32> to vector<32x1xi32>
    %14 = vector.broadcast %13 : vector<32x1xi32> to vector<32x16xi32>
    %15 = arith.cmpi eq, %5, %14 : vector<32x16xi32>
    %16 = arith.extui %15 : vector<32x16xi1> to vector<32x16xi32>
    %17 = arith.sitofp %16 : vector<32x16xi32> to vector<32x16xf32>
    %18 = vector.extract_strided_slice %0 {offsets = [0, 24], sizes = [32, 1], strides = [1, 1]} : vector<32x128xf32> to vector<32x1xf32>
    %19 = vector.broadcast %18 : vector<32x1xf32> to vector<32x16xf32>
    %20 = arith.mulf %17, %19 : vector<32x16xf32>
    %cst_3 = arith.constant 4.000000e+00 : f32
    %21 = vector.broadcast %cst_3 : f32 to vector<32x16xf32>
    %22 = arith.cmpf ole, %4, %21 : vector<32x16xf32>
    %23 = arith.extui %22 : vector<32x16xi1> to vector<32x16xi32>
    %24 = arith.sitofp %23 : vector<32x16xi32> to vector<32x16xf32>
    %cst_4 = arith.constant dense<0.000000e+00> : vector<32xf32>
    %25 = vector.multi_reduction <add>, %24, %cst_4 [1] : vector<32x16xf32> to vector<32xf32>
    %26 = vector.shape_cast %25 : vector<32xf32> to vector<32x1xf32>
    %cst_5 = arith.constant 1.000000e+00 : f32
    %27 = vector.broadcast %cst_5 : f32 to vector<32x1xf32>
    %28 = arith.maximumf %26, %27 : vector<32x1xf32>
    %29 = tpu.reciprocal %28 {approx = true} : vector<32x1xf32> -> vector<32x1xf32>
    %30 = vector.broadcast %29 : vector<32x1xf32> to vector<32x16xf32>
    %31 = arith.mulf %24, %30 : vector<32x16xf32>
    %32 = arith.addf %20, %31 : vector<32x16xf32>
    %c96_6 = arith.constant 96 : index
    %c0_7 = arith.constant 0 : index
    %33 = vector.load %arg1[%c96_6, %c0_7] : memref<112x128xf32, #tpu.memory_space<vmem>>, vector<16x128xf32>
    %cst_8 = arith.constant dense<0.000000e+00> : vector<32x128xf32>
    %34 = tpu.matmul %32, %33, %cst_8 {dimension_numbers = #tpu.dot_dimension_numbers<[1], [0], [0], [1], [0, 0, 1, 1], [], []>} : vector<32x16xf32>, vector<16x128xf32>, vector<32x128xf32> -> vector<32x128xf32>
    %cst_9 = arith.constant 0.000000e+00 : f32
    %35 = vector.broadcast %cst_9 : f32 to vector<32x128xf32>
    %36 = arith.maximumf %34, %35 : vector<32x128xf32>
    %c544 = arith.constant 544 : index
    %c0_10 = arith.constant 0 : index
    %37 = vector.load %arg2[%c544, %c0_10] : memref<1360x128xf32, #tpu.memory_space<vmem>>, vector<128x128xf32>
    %cst_11 = arith.constant dense<0.000000e+00> : vector<32x128xf32>
    %38 = tpu.matmul %36, %37, %cst_11 {dimension_numbers = #tpu.dot_dimension_numbers<[1], [0], [0], [1], [0, 0, 1, 1], [], []>} : vector<32x128xf32>, vector<128x128xf32>, vector<32x128xf32> -> vector<32x128xf32>
    %c672 = arith.constant 672 : index
    %c0_12 = arith.constant 0 : index
    %39 = vector.load %arg2[%c672, %c0_12] : memref<1360x128xf32, #tpu.memory_space<vmem>>, vector<1x128xf32>
    %40 = vector.broadcast %39 : vector<1x128xf32> to vector<32x128xf32>
    %41 = arith.addf %38, %40 : vector<32x128xf32>
    %c64_13 = arith.constant 64 : index
    %c0_14 = arith.constant 0 : index
    %42 = vector.load %arg1[%c64_13, %c0_14] : memref<112x128xf32, #tpu.memory_space<vmem>>, vector<32x128xf32>
    %43 = arith.addf %41, %42 : vector<32x128xf32>
    %c64_15 = arith.constant 64 : index
    %c0_16 = arith.constant 0 : index
    %44 = vector.load %arg0[%c64_15, %c0_16] : memref<112x128xf32, #tpu.memory_space<vmem>>, vector<32x128xf32>
    %45 = vector.extract_strided_slice %44 {offsets = [0, 0], sizes = [32, 8], strides = [1, 1]} : vector<32x128xf32> to vector<32x8xf32>
    %46 = vector.extract_strided_slice %44 {offsets = [0, 8], sizes = [32, 8], strides = [1, 1]} : vector<32x128xf32> to vector<32x8xf32>
    %cst_17 = arith.constant dense<0.000000e+00> : vector<32x32xf32>
    %47 = tpu.matmul %45, %46, %cst_17 {dimension_numbers = #tpu.dot_dimension_numbers<[1], [1], [0], [0], [0, 0, 1, 0], [], []>} : vector<32x8xf32>, vector<32x8xf32>, vector<32x32xf32> -> vector<32x32xf32>
    %48 = tpu.iota {dimensions = array<i32: 1>} : vector<32x32xi32>
    %cst_18 = arith.constant dense<0x7F800000> : vector<32xf32>
    %49 = vector.multi_reduction <minimumf>, %47, %cst_18 [1] : vector<32x32xf32> to vector<32xf32>
    %50 = vector.shape_cast %49 : vector<32xf32> to vector<32x1xf32>
    %51 = vector.broadcast %50 : vector<32x1xf32> to vector<32x32xf32>
    %52 = arith.cmpf ole, %47, %51 : vector<32x32xf32>
    %c32_i32 = arith.constant 32 : i32
    %53 = vector.broadcast %c32_i32 : i32 to vector<32x32xi32>
    %54 = arith.select %52, %48, %53 : vector<32x32xi1>, vector<32x32xi32>
    %cst_19 = arith.constant dense<2147483647> : vector<32xi32>
    %55 = vector.multi_reduction <minsi>, %54, %cst_19 [1] : vector<32x32xi32> to vector<32xi32>
    %56 = vector.shape_cast %55 : vector<32xi32> to vector<32x1xi32>
    %57 = vector.broadcast %56 : vector<32x1xi32> to vector<32x32xi32>
    %58 = arith.cmpi eq, %48, %57 : vector<32x32xi32>
    %59 = arith.extui %58 : vector<32x32xi1> to vector<32x32xi32>
    %60 = arith.sitofp %59 : vector<32x32xi32> to vector<32x32xf32>
    %61 = vector.extract_strided_slice %44 {offsets = [0, 24], sizes = [32, 1], strides = [1, 1]} : vector<32x128xf32> to vector<32x1xf32>
    %62 = vector.broadcast %61 : vector<32x1xf32> to vector<32x32xf32>
    %63 = arith.mulf %60, %62 : vector<32x32xf32>
    %cst_20 = arith.constant 1.000000e+00 : f32
    %64 = vector.broadcast %cst_20 : f32 to vector<32x32xf32>
    %65 = arith.cmpf ole, %47, %64 : vector<32x32xf32>
    %66 = arith.extui %65 : vector<32x32xi1> to vector<32x32xi32>
    %67 = arith.sitofp %66 : vector<32x32xi32> to vector<32x32xf32>
    %cst_21 = arith.constant dense<0.000000e+00> : vector<32xf32>
    %68 = vector.multi_reduction <add>, %67, %cst_21 [1] : vector<32x32xf32> to vector<32xf32>
    %69 = vector.shape_cast %68 : vector<32xf32> to vector<32x1xf32>
    %cst_22 = arith.constant 1.000000e+00 : f32
    %70 = vector.broadcast %cst_22 : f32 to vector<32x1xf32>
    %71 = arith.maximumf %69, %70 : vector<32x1xf32>
    %72 = tpu.reciprocal %71 {approx = true} : vector<32x1xf32> -> vector<32x1xf32>
    %73 = vector.broadcast %72 : vector<32x1xf32> to vector<32x32xf32>
    %74 = arith.mulf %67, %73 : vector<32x32xf32>
    %75 = arith.addf %63, %74 : vector<32x32xf32>
    %cst_23 = arith.constant dense<0.000000e+00> : vector<32x128xf32>
    %76 = tpu.matmul %75, %43, %cst_23 {dimension_numbers = #tpu.dot_dimension_numbers<[1], [0], [0], [1], [0, 0, 1, 1], [], []>} : vector<32x32xf32>, vector<32x128xf32>, vector<32x128xf32> -> vector<32x128xf32>
    %cst_24 = arith.constant 0.000000e+00 : f32
    %77 = vector.broadcast %cst_24 : f32 to vector<32x128xf32>
    %78 = arith.maximumf %76, %77 : vector<32x128xf32>
    %c272 = arith.constant 272 : index
    %c0_25 = arith.constant 0 : index
    %79 = vector.load %arg2[%c272, %c0_25] : memref<1360x128xf32, #tpu.memory_space<vmem>>, vector<128x128xf32>
    %cst_26 = arith.constant dense<0.000000e+00> : vector<32x128xf32>
    %80 = tpu.matmul %78, %79, %cst_26 {dimension_numbers = #tpu.dot_dimension_numbers<[1], [0], [0], [1], [0, 0, 1, 1], [], []>} : vector<32x128xf32>, vector<128x128xf32>, vector<32x128xf32> -> vector<32x128xf32>
    %c400 = arith.constant 400 : index
    %c0_27 = arith.constant 0 : index
    %81 = vector.load %arg2[%c400, %c0_27] : memref<1360x128xf32, #tpu.memory_space<vmem>>, vector<1x128xf32>
    %82 = vector.broadcast %81 : vector<1x128xf32> to vector<32x128xf32>
    %83 = arith.addf %80, %82 : vector<32x128xf32>
    %84 = vector.extract_strided_slice %44 {offsets = [0, 24], sizes = [32, 1], strides = [1, 1]} : vector<32x128xf32> to vector<32x1xf32>
    %85 = vector.broadcast %84 : vector<32x1xf32> to vector<32x128xf32>
    %86 = arith.mulf %83, %85 : vector<32x128xf32>
    %c64_28 = arith.constant 64 : index
    %c0_29 = arith.constant 0 : index
    %87 = vector.load %arg1[%c64_28, %c0_29] : memref<112x128xf32, #tpu.memory_space<vmem>>, vector<32x128xf32>
    %c408 = arith.constant 408 : index
    %c0_30 = arith.constant 0 : index
    %88 = vector.load %arg2[%c408, %c0_30] : memref<1360x128xf32, #tpu.memory_space<vmem>>, vector<128x128xf32>
    %cst_31 = arith.constant dense<0.000000e+00> : vector<32x128xf32>
    %89 = tpu.matmul %87, %88, %cst_31 {dimension_numbers = #tpu.dot_dimension_numbers<[1], [0], [0], [1], [0, 0, 1, 1], [], []>} : vector<32x128xf32>, vector<128x128xf32>, vector<32x128xf32> -> vector<32x128xf32>
    %90 = arith.addf %86, %89 : vector<32x128xf32>
    %c536 = arith.constant 536 : index
    %c0_32 = arith.constant 0 : index
    %91 = vector.load %arg2[%c536, %c0_32] : memref<1360x128xf32, #tpu.memory_space<vmem>>, vector<1x128xf32>
    %92 = vector.broadcast %91 : vector<1x128xf32> to vector<32x128xf32>
    %93 = arith.addf %90, %92 : vector<32x128xf32>
    %c0_33 = arith.constant 0 : index
    %c0_34 = arith.constant 0 : index
    %94 = vector.load %arg0[%c0_33, %c0_34] : memref<112x128xf32, #tpu.memory_space<vmem>>, vector<64x128xf32>
    %c64_35 = arith.constant 64 : index
    %c0_36 = arith.constant 0 : index
    %95 = vector.load %arg0[%c64_35, %c0_36] : memref<112x128xf32, #tpu.memory_space<vmem>>, vector<32x128xf32>
    %96 = vector.extract_strided_slice %94 {offsets = [0, 0], sizes = [64, 8], strides = [1, 1]} : vector<64x128xf32> to vector<64x8xf32>
    %97 = vector.extract_strided_slice %95 {offsets = [0, 8], sizes = [32, 8], strides = [1, 1]} : vector<32x128xf32> to vector<32x8xf32>
    %cst_37 = arith.constant dense<0.000000e+00> : vector<64x32xf32>
    %98 = tpu.matmul %96, %97, %cst_37 {dimension_numbers = #tpu.dot_dimension_numbers<[1], [1], [0], [0], [0, 0, 1, 0], [], []>} : vector<64x8xf32>, vector<32x8xf32>, vector<64x32xf32> -> vector<64x32xf32>
    %99 = tpu.iota {dimensions = array<i32: 1>} : vector<64x32xi32>
    %cst_38 = arith.constant dense<0x7F800000> : vector<64xf32>
    %100 = vector.multi_reduction <minimumf>, %98, %cst_38 [1] : vector<64x32xf32> to vector<64xf32>
    %101 = vector.shape_cast %100 : vector<64xf32> to vector<64x1xf32>
    %102 = vector.broadcast %101 : vector<64x1xf32> to vector<64x32xf32>
    %103 = arith.cmpf ole, %98, %102 : vector<64x32xf32>
    %c32_i32_39 = arith.constant 32 : i32
    %104 = vector.broadcast %c32_i32_39 : i32 to vector<64x32xi32>
    %105 = arith.select %103, %99, %104 : vector<64x32xi1>, vector<64x32xi32>
    %cst_40 = arith.constant dense<2147483647> : vector<64xi32>
    %106 = vector.multi_reduction <minsi>, %105, %cst_40 [1] : vector<64x32xi32> to vector<64xi32>
    %107 = vector.shape_cast %106 : vector<64xi32> to vector<64x1xi32>
    %108 = vector.broadcast %107 : vector<64x1xi32> to vector<64x32xi32>
    %109 = arith.cmpi eq, %99, %108 : vector<64x32xi32>
    %110 = arith.extui %109 : vector<64x32xi1> to vector<64x32xi32>
    %111 = arith.sitofp %110 : vector<64x32xi32> to vector<64x32xf32>
    %cst_41 = arith.constant 2.500000e-01 : f32
    %112 = vector.broadcast %cst_41 : f32 to vector<64x32xf32>
    %113 = arith.cmpf ole, %98, %112 : vector<64x32xf32>
    %114 = arith.extui %113 : vector<64x32xi1> to vector<64x32xi32>
    %115 = arith.sitofp %114 : vector<64x32xi32> to vector<64x32xf32>
    %cst_42 = arith.constant dense<0.000000e+00> : vector<64xf32>
    %116 = vector.multi_reduction <add>, %115, %cst_42 [1] : vector<64x32xf32> to vector<64xf32>
    %117 = vector.shape_cast %116 : vector<64xf32> to vector<64x1xf32>
    %cst_43 = arith.constant 1.000000e+00 : f32
    %118 = vector.broadcast %cst_43 : f32 to vector<64x1xf32>
    %119 = arith.maximumf %117, %118 : vector<64x1xf32>
    %120 = tpu.reciprocal %119 {approx = true} : vector<64x1xf32> -> vector<64x1xf32>
    %121 = vector.broadcast %120 : vector<64x1xf32> to vector<64x32xf32>
    %122 = arith.mulf %115, %121 : vector<64x32xf32>
    %123 = arith.addf %111, %122 : vector<64x32xf32>
    %cst_44 = arith.constant dense<0.000000e+00> : vector<64x128xf32>
    %124 = tpu.matmul %123, %93, %cst_44 {dimension_numbers = #tpu.dot_dimension_numbers<[1], [0], [0], [1], [0, 0, 1, 1], [], []>} : vector<64x32xf32>, vector<32x128xf32>, vector<64x128xf32> -> vector<64x128xf32>
    %cst_45 = arith.constant 0.000000e+00 : f32
    %125 = vector.broadcast %cst_45 : f32 to vector<64x128xf32>
    %126 = arith.maximumf %124, %125 : vector<64x128xf32>
    %c0_46 = arith.constant 0 : index
    %c0_47 = arith.constant 0 : index
    %127 = vector.load %arg2[%c0_46, %c0_47] : memref<1360x128xf32, #tpu.memory_space<vmem>>, vector<128x128xf32>
    %cst_48 = arith.constant dense<0.000000e+00> : vector<64x128xf32>
    %128 = tpu.matmul %126, %127, %cst_48 {dimension_numbers = #tpu.dot_dimension_numbers<[1], [0], [0], [1], [0, 0, 1, 1], [], []>} : vector<64x128xf32>, vector<128x128xf32>, vector<64x128xf32> -> vector<64x128xf32>
    %c128 = arith.constant 128 : index
    %c0_49 = arith.constant 0 : index
    %129 = vector.load %arg2[%c128, %c0_49] : memref<1360x128xf32, #tpu.memory_space<vmem>>, vector<1x128xf32>
    %130 = vector.broadcast %129 : vector<1x128xf32> to vector<64x128xf32>
    %131 = arith.addf %128, %130 : vector<64x128xf32>
    %c0_50 = arith.constant 0 : index
    %c0_51 = arith.constant 0 : index
    %132 = vector.load %arg1[%c0_50, %c0_51] : memref<112x128xf32, #tpu.memory_space<vmem>>, vector<64x128xf32>
    %c136 = arith.constant 136 : index
    %c0_52 = arith.constant 0 : index
    %133 = vector.load %arg2[%c136, %c0_52] : memref<1360x128xf32, #tpu.memory_space<vmem>>, vector<128x128xf32>
    %cst_53 = arith.constant dense<0.000000e+00> : vector<64x128xf32>
    %134 = tpu.matmul %132, %133, %cst_53 {dimension_numbers = #tpu.dot_dimension_numbers<[1], [0], [0], [1], [0, 0, 1, 1], [], []>} : vector<64x128xf32>, vector<128x128xf32>, vector<64x128xf32> -> vector<64x128xf32>
    %135 = arith.addf %131, %134 : vector<64x128xf32>
    %c264 = arith.constant 264 : index
    %c0_54 = arith.constant 0 : index
    %136 = vector.load %arg2[%c264, %c0_54] : memref<1360x128xf32, #tpu.memory_space<vmem>>, vector<1x128xf32>
    %137 = vector.broadcast %136 : vector<1x128xf32> to vector<64x128xf32>
    %138 = arith.addf %135, %137 : vector<64x128xf32>
    %c816 = arith.constant 816 : index
    %c0_55 = arith.constant 0 : index
    %139 = vector.load %arg2[%c816, %c0_55] : memref<1360x128xf32, #tpu.memory_space<vmem>>, vector<128x128xf32>
    %cst_56 = arith.constant dense<0.000000e+00> : vector<64x128xf32>
    %140 = tpu.matmul %138, %139, %cst_56 {dimension_numbers = #tpu.dot_dimension_numbers<[1], [0], [0], [1], [0, 0, 1, 1], [], []>} : vector<64x128xf32>, vector<128x128xf32>, vector<64x128xf32> -> vector<64x128xf32>
    %c944 = arith.constant 944 : index
    %c0_57 = arith.constant 0 : index
    %141 = vector.load %arg2[%c944, %c0_57] : memref<1360x128xf32, #tpu.memory_space<vmem>>, vector<1x128xf32>
    %142 = vector.broadcast %141 : vector<1x128xf32> to vector<64x128xf32>
    %143 = arith.addf %140, %142 : vector<64x128xf32>
    %cst_58 = arith.constant 0.000000e+00 : f32
    %144 = vector.broadcast %cst_58 : f32 to vector<64x128xf32>
    %145 = arith.maximumf %143, %144 : vector<64x128xf32>
    %c952 = arith.constant 952 : index
    %c0_59 = arith.constant 0 : index
    %146 = vector.load %arg2[%c952, %c0_59] : memref<1360x128xf32, #tpu.memory_space<vmem>>, vector<128x128xf32>
    %cst_60 = arith.constant dense<0.000000e+00> : vector<64x128xf32>
    %147 = tpu.matmul %145, %146, %cst_60 {dimension_numbers = #tpu.dot_dimension_numbers<[1], [0], [0], [1], [0, 0, 1, 1], [], []>} : vector<64x128xf32>, vector<128x128xf32>, vector<64x128xf32> -> vector<64x128xf32>
    %c1080 = arith.constant 1080 : index
    %c0_61 = arith.constant 0 : index
    %148 = vector.load %arg2[%c1080, %c0_61] : memref<1360x128xf32, #tpu.memory_space<vmem>>, vector<1x128xf32>
    %149 = vector.broadcast %148 : vector<1x128xf32> to vector<64x128xf32>
    %150 = arith.addf %147, %149 : vector<64x128xf32>
    %cst_62 = arith.constant 0.000000e+00 : f32
    %151 = vector.broadcast %cst_62 : f32 to vector<64x128xf32>
    %152 = arith.maximumf %150, %151 : vector<64x128xf32>
    %c1088 = arith.constant 1088 : index
    %c0_63 = arith.constant 0 : index
    %153 = vector.load %arg2[%c1088, %c0_63] : memref<1360x128xf32, #tpu.memory_space<vmem>>, vector<128x128xf32>
    %cst_64 = arith.constant dense<0.000000e+00> : vector<64x128xf32>
    %154 = tpu.matmul %152, %153, %cst_64 {dimension_numbers = #tpu.dot_dimension_numbers<[1], [0], [0], [1], [0, 0, 1, 1], [], []>} : vector<64x128xf32>, vector<128x128xf32>, vector<64x128xf32> -> vector<64x128xf32>
    %c1216 = arith.constant 1216 : index
    %c0_65 = arith.constant 0 : index
    %155 = vector.load %arg2[%c1216, %c0_65] : memref<1360x128xf32, #tpu.memory_space<vmem>>, vector<1x128xf32>
    %156 = vector.broadcast %155 : vector<1x128xf32> to vector<64x128xf32>
    %157 = arith.addf %154, %156 : vector<64x128xf32>
    %cst_66 = arith.constant 0.000000e+00 : f32
    %158 = vector.broadcast %cst_66 : f32 to vector<64x128xf32>
    %159 = arith.maximumf %157, %158 : vector<64x128xf32>
    %c1224 = arith.constant 1224 : index
    %c0_67 = arith.constant 0 : index
    %160 = vector.load %arg2[%c1224, %c0_67] : memref<1360x128xf32, #tpu.memory_space<vmem>>, vector<128x128xf32>
    %cst_68 = arith.constant dense<0.000000e+00> : vector<64x128xf32>
    %161 = tpu.matmul %159, %160, %cst_68 {dimension_numbers = #tpu.dot_dimension_numbers<[1], [0], [0], [1], [0, 0, 1, 1], [], []>} : vector<64x128xf32>, vector<128x128xf32>, vector<64x128xf32> -> vector<64x128xf32>
    %c1352 = arith.constant 1352 : index
    %c0_69 = arith.constant 0 : index
    %162 = vector.load %arg2[%c1352, %c0_69] : memref<1360x128xf32, #tpu.memory_space<vmem>>, vector<1x128xf32>
    %163 = vector.broadcast %162 : vector<1x128xf32> to vector<64x128xf32>
    %164 = arith.addf %161, %163 : vector<64x128xf32>
    %c0_70 = arith.constant 0 : index
    %c0_71 = arith.constant 0 : index
    %165 = vector.load %arg3[%c0_70, %c0_71] : memref<64x128xf32, #tpu.memory_space<vmem>>, vector<64x128xf32>
    tpu.vector_store %arg3[%c0_70, %c0_71], %164 {strides = array<i32>} : memref<64x128xf32, #tpu.memory_space<vmem>>, vector<64x128xf32>,
    return
  }
}

</mosaic_0001>

<bundles_post_ra>
// kernel: tpu_custom_call.1
= control target key start
LH: loop header
LB: loop body
LE: loop exit
PB: predicated region body
PF: predicated region fallthrough
CT: control target
= control target key end

     0   :  { %8 = vsyncpa [#allocation3], 0  ;;  %s3963_s0 = inlined_call_operand.hbm [shape: f32[112,128], index: 0, kind: input, shape index: {}]   ;;  %s3964_s1 = inlined_call_operand.hbm [shape: f32[112,128], index: 1, kind: input, shape index: {}]   ;;  %s3965_s2 = inlined_call_operand.hbm [shape: f32[1360,128], index: 2, kind: input, shape index: {}]   ;;  %s3966_s3 = inlined_call_operand.hbm [shape: f32[64,128], index: 3, kind: output, shape index: {}]  }
   0x1   :  { %9 = vsyncpa [#allocation6], 0 }
   0x2   :  { %10 = vsyncpa [#allocation4], 0  ;;  %s3408_s12 = smov [#allocation5]   ;;  %s3409_s14 = smov [#allocation2]  }
   0x3   :  { %s28_s13 = sshll.u32 %s3408_s12, 4  ;;  %s16_s15 = sshll.u32 %s3409_s14, 4  ;;  %s29_s13 = int_to_ptr.vmem [resolvable:$true] %s28_s13  ;;  %s17_s15 = int_to_ptr.vmem [resolvable:$true] %s16_s15 }
   0x4   :  { %s3330_s16 = scalar_lea.vmem %s29_s13, 1792  ;;  %p3335_p1 = scmp.lt.s32.totalorder %s29_s13, %s29_s13 }
   0x5   :  { %p3331_p0 = scmp.ne.s32.totalorder %s29_s13, %s3330_s16  ;;  %p3336_p2 = scmp.lt.s32.totalorder %s3330_s16, %s3330_s16 }
   0x7   :  { %p3337_p3 = por %p3336_p2, %p3335_p1 }
   0x9   :  { %p3338_p4 = pnand %p3337_p3, %p3331_p0 }
   0xb   :  { %3341 = shalt.err (!%p3338_p4)
}
   0xc   :  { %s3410_s17 = smov 128   ;;  %s3411_s18 = smov 8  }
   0xd   :  { %34 = dma.hbm_to_vmem [thread:$0]  %s3964_s1, 1792, %s29_s13, [#allocation6], %s3410_s17, %s3410_s17, %s3411_s18  }
   0xe   :  { %s3350_s21 = scalar_lea.vmem %s17_s15, 1792  ;;  %p3355_p6 = scmp.lt.s32.totalorder %s17_s15, %s17_s15 }
   0xf   :  { %p3351_p5 = scmp.ne.s32.totalorder %s17_s15, %s3350_s21  ;;  %p3356_p7 = scmp.lt.s32.totalorder %s3350_s21, %s3350_s21 }
  0x11   :  { %p3357_p8 = por %p3356_p7, %p3355_p6 }
  0x13   :  { %p3358_p9 = pnand %p3357_p8, %p3351_p5 }
  0x15   :  { %3361 = shalt.err (!%p3358_p9)
}
  0x16   :  { %22 = dma.hbm_to_vmem [thread:$0]  %s3963_s0, 1792, %s17_s15, [#allocation3], %s3410_s17, %s3410_s17, %s3411_s18  }
  0x17   :  { %s3412_s24 = smov [#allocation7]  }
  0x18   :  { %s40_s25 = sshll.u32 %s3412_s24, 4  ;;  %s41_s25 = int_to_ptr.vmem [resolvable:$true] %s40_s25 }
  0x19   :  { %s3370_s26 = scalar_lea.vmem %s41_s25, 21760  ;;  %p3375_p11 = scmp.lt.s32.totalorder %s41_s25, %s41_s25 }
  0x1a   :  { %p3371_p10 = scmp.ne.s32.totalorder %s41_s25, %s3370_s26  ;;  %p3376_p12 = scmp.lt.s32.totalorder %s3370_s26, %s3370_s26 }
  0x1c   :  { %p3377_p13 = por %p3376_p12, %p3375_p11 }
  0x1e   :  { %p3378_p0 = pnand %p3377_p13, %p3371_p10 }
  0x20   :  { %3381 = shalt.err (!%p3378_p0)
}
  0x21   :  { %46 = dma.hbm_to_vmem [thread:$0]  %s3965_s2, 21760, %s41_s25, [#allocation6], %s3410_s17, %s3410_s17, %s3411_s18  }
  0x22   :  { %3402 = dma.done.wait [#allocation3], 1792  }
  0x23   :  { %3403 = vsyncadd [#allocation3], 4294965504 }
  0x24   :  { %3404 = dma.done.wait [#allocation6], 23552  }
  0x25   :  { %3405 = vsyncadd [#allocation6], 4294943744  ;;  %v61_v0 = vld [vmem:[#allocation2 + $0x68] sm:$0xff]  ;;  %vm68_vm0 = vcmask 64512   ;;  %v56_v1 = vld [vmem:[#allocation2 + $0x40] sm:$0xff]  ;;  %s3413_s0 = smov 112   ;;  %v170_v26 = vlaneseq }
  0x26   :  { %66 = vrot.lane.b32.xlu0 %v61_v0, %s3413_s0  ;;  %2816 = vmatprep.mubr.msk.f32.mxu0 %vm68_vm0, %v56_v1  ;;  %v60_v2 = vld [vmem:[#allocation2 + $0x60] sm:$0xff]  ;;  %v3461_v5 = vld [vmem:[#allocation2 + $0x48] sm:$0xff]  ;;  %v3463_v6 = vld [vmem:[#allocation2 + $0x50] sm:$0xff]  ;;  %v3414_v8 = vmov 24   ;;  %vm172_vm1 = vcmask 130048   ;;  %v3415_v17 = vmov 0.0  }
  0x27   :  { %v3469_v7 = vld [vmem:[#allocation2 + $0x58] sm:$0xff]  ;;  %3288 = vset.pattern.permute.xlu0 %v3414_v8  ;;  %3289 = vset.pattern.permute.xlu1 %v3414_v8  ;;  %s3416_s2 = smov 120   ;;  %v3501_v27 = vand.u32 127, %v170_v26  ;;  %vm643_vm14 = vcmask 261120   ;;  %s3417_s28 = smov [#allocation8]  }
  0x28   :  { %s2460_s29 = sshll.u32 %s3417_s28, 4  ;;  %s2461_s29 = int_to_ptr.vmem [resolvable:$true] %s2460_s29 }
  0x29   :  { %s3382_s30 = scalar_lea.vmem %s2461_s29, 1024  ;;  %p3387_p2 = scmp.lt.s32.totalorder %s2461_s29, %s2461_s29 }
  0x2a   :  { %64 = vrot.lane.b32.xlu0 %v60_v2, %s3413_s0  ;;  %p3383_p1 = scmp.ne.s32.totalorder %s2461_s29, %s3382_s30  ;;  %p3388_p3 = scmp.lt.s32.totalorder %s3382_s30, %s3382_s30 }
  0x2c   :  { %p3389_p4 = por %p3388_p3, %p3387_p2 }
  0x2e   :  { %p3390_p5 = pnand %p3389_p4, %p3383_p1 }
  0x98   :  { %v67_v3 = vpop.permute.xlu0 %66 }
  0x99   :  { %2812 = vmatprep.subr.msk.mxu0 %vm68_vm0, %v67_v3 }
  0x9a   :  { %2813 = vmatpush3.xpose.msk.msra.mxu0 %vm68_vm0, %v67_v3 }
  0x9c   :  { %v65_v4 = vpop.permute.xlu0 %64 }
  0x9d   :  { %2814 = vmatprep.subr.msk.mxu0 %vm68_vm0, %v65_v4 }
  0x9e   :  { %2815 = vmatpush3.xpose.msk.msra.mxu0 %vm68_vm0, %v65_v4 }
  0xa1   :  { %2817 = vmatmul.mubr.msk.f32.vlgmr.msra.gmra.mxu0 %vm68_vm0, %v3461_v5 }
  0xa2   :  { %2819 = vmatprep.mubr.msk.f32.mxu0 %vm68_vm0, %v3463_v6 }
  0xa5   :  { %2820 = vmatmul.mubr.msk.f32.gmra.mxu0 %vm68_vm0, %v3469_v7 }
  0xa6   :  { %2878 = vmatprep.mubr.msk.f32.mxu0 %vm68_vm0, %v56_v1 }
 0x161   :  { %v2818_v9 = vpop.f32.mrf.mxu0 }
 0x162   :  { %v176_v10 = vsel %vm172_vm1, %v2818_v9, inf  ;;  %vm286_vm3 = vcmp.le.f32.partialorder %v2818_v9, 4.0 }
 0x163   :  { %177 = vmin.xlane.f32.xlu1 %v176_v10  ;;  %v151_v11 = vpop.f32.mrf.mxu0  ;;  %v3484_v20 = vsel %vm286_vm3, 1.0, %v3415_v17  ;;  %v325_v10 = vld [vmem:[#allocation5 + $0x60] sm:$0xff] }
 0x164   :  { %v173_v13 = vsel %vm172_vm1, %v151_v11, inf  ;;  %vm285_vm2 = vcmp.le.f32.partialorder %v151_v11, 4.0  ;;  %v300_v21 = vsel %vm172_vm1, %v3484_v20, 0.0 }
 0x165   :  { %v2821_v12 = vpop.f32.mrf.mxu0  ;;  %v3479_v18 = vsel %vm285_vm2, 1.0, %v3415_v17 }
 0x166   :  { %v182_v16 = vsel %vm172_vm1, %v2821_v12, inf  ;;  %v297_v19 = vsel %vm172_vm1, %v3479_v18, 0.0  ;;  %vm288_vm4 = vcmp.le.f32.partialorder %v2821_v12, 4.0 }
 0x167   :  { %174 = vmin.xlane.f32.xlu1 %v173_v13  ;;  %v161_v14 = vpop.f32.mrf.mxu0  ;;  %v3492_v22 = vsel %vm288_vm4, 1.0, %v3415_v17 }
 0x168   :  { %v179_v15 = vsel %vm172_vm1, %v161_v14, inf  ;;  %vm287_vm5 = vcmp.le.f32.partialorder %v161_v14, 4.0  ;;  %v306_v24 = vsel %vm172_vm1, %v3492_v22, 0.0 }
 0x169   :  { %180 = vmin.xlane.f32.xlu0 %v179_v15  ;;  %v3495_v23 = vsel %vm287_vm5, 1.0, %v3415_v17 }
 0x16a   :  { %v303_v25 = vsel %vm172_vm1, %v3495_v23, 0.0 }
 0x16b   :  { %183 = vmin.xlane.f32.xlu1 %v182_v16 }
 0x16d   :  { %298 = vadd.xlane.f32.xlu0 %v297_v19  ;;  %v443_v19 = vld [vmem:[#allocation7 + $0x298] sm:$0xff] }
 0x171   :  { %301 = vadd.xlane.f32.xlu0 %v300_v21 }
 0x17c   :  { %548 = vrot.lane.b32.xlu1 %v3469_v7, %s3416_s2 }
 0x180   :  { %546 = vrot.lane.b32.xlu1 %v3463_v6, %s3416_s2 }
 0x184   :  { %542 = vrot.lane.b32.xlu1 %v56_v1, %s3416_s2 }
 0x187   :  { %544 = vrot.lane.b32.xlu0 %v3461_v5, %s3416_s2 }
 0x18b   :  { %266 = vperm.xlu0 %3288, %v56_v1  }
 0x1a8   :  { %307 = vadd.xlane.f32.xlu1 %v306_v24 }
 0x1aa   :  { %304 = vadd.xlane.f32.xlu0 %v303_v25 }
 0x1ec   :  { %v178_v28 = vpop.xlane.xlu1 %177 }
 0x1ed   :  { %vm186_vm6 = vcmp.le.f32.partialorder %v2818_v9, %v178_v28  ;;  %v326_v9 = vld [vmem:[#allocation5 + $0x68] sm:$0xff] }
 0x1ee   :  { %v190_v29 = vsel %vm186_vm6, %v3501_v27, 16  ;;  %2822 = vmatprep.subr.mxu1 %v326_v9 }
 0x1ef   :  { %v208_v30 = vsel %vm172_vm1, %v190_v29, 2147483647  ;;  %2823 = vmatpush3.msra.mxu1 %v326_v9  ;;  %v440_v9 = vld [vmem:[#allocation7 + $0x280] sm:$0xff] }
 0x1f0   :  { %v175_v31 = vpop.xlane.xlu1 %174  ;;  %v210_v32 = vshra.s32 %v208_v30, 16  ;;  %v209_v55 = vand.u32 65535, %v208_v30  ;;  %2824 = vmatprep.subr.mxu1 %v325_v10 }
 0x1f1   :  { %vm185_vm7 = vcmp.le.f32.partialorder %v151_v11, %v175_v31  ;;  %2825 = vmatpush3.msra.mxu1 %v325_v10 }
 0x1f2   :  { %v189_v33 = vsel %vm185_vm7, %v3501_v27, 16  ;;  %v181_v34 = vpop.xlane.xlu0 %180  ;;  %v212_v35 = vcvt.s32.f32 %v210_v32  ;;  %v211_v57 = vcvt.s32.f32 %v209_v55  ;;  %2832 = vmatprep.subr.mxu1 %v443_v19 }
 0x1f3   :  { %v193_v36 = vsel %vm172_vm1, %v189_v33, 2147483647  ;;  %vm187_vm8 = vcmp.le.f32.partialorder %v161_v14, %v181_v34 }
 0x1f4   :  { %v191_v37 = vsel %vm187_vm8, %v3501_v27, 16  ;;  %213 = vmin.xlane.f32.xlu1 %v212_v35  ;;  %v184_v38 = vpop.xlane.xlu1 %183  ;;  %v195_v39 = vshra.s32 %v193_v36, 16  ;;  %v194_v58 = vand.u32 65535, %v193_v36 }
 0x1f5   :  { %vm188_vm9 = vcmp.le.f32.partialorder %v2821_v12, %v184_v38  ;;  %v223_v43 = vsel %vm172_vm1, %v191_v37, 2147483647 }
 0x1f6   :  { %v192_v40 = vsel %vm188_vm9, %v3501_v27, 16  ;;  %v3509_v41 = vpop.xlane.xlu0 %298  ;;  %v197_v42 = vcvt.s32.f32 %v195_v39  ;;  %v225_v49 = vshra.s32 %v223_v43, 16  ;;  %v196_v61 = vcvt.s32.f32 %v194_v58 }
 0x1f7   :  { %v238_v44 = vsel %vm172_vm1, %v192_v40, 2147483647  ;;  %v224_v2 = vand.u32 65535, %v223_v43  ;;  %v309_v25 = vmax.f32 %v3509_v41, 1.0 }
 0x1f8   :  { %198 = vmin.xlane.f32.xlu1 %v197_v42  ;;  %v3513_v45 = vpop.permute.xlu1 %548  ;;  %v240_v46 = vshra.s32 %v238_v44, 16  ;;  %v227_v51 = vcvt.s32.f32 %v225_v49  ;;  %v239_v62 = vand.u32 65535, %v238_v44 }
 0x1f9   :  { %2870 = vmatprep.subr.msk.mxu0 %vm68_vm0, %v3513_v45 }
 0x1fa   :  { %2871 = vmatpush3.xpose.msk.msra.mxu0 %vm68_vm0, %v3513_v45  ;;  %v3519_v47 = vpop.xlane.xlu0 %301  ;;  %v242_v48 = vcvt.s32.f32 %v240_v46  ;;  %v241_v1 = vcvt.s32.f32 %v239_v62 }
 0x1fb   :  { %v310_v21 = vmax.f32 %v3519_v47, 1.0 }
 0x1fc   :  { %243 = vmin.xlane.f32.xlu1 %v242_v48  ;;  %v3521_v50 = vpop.permute.xlu1 %546 }
 0x1fd   :  { %2872 = vmatprep.subr.msk.mxu0 %vm68_vm0, %v3521_v50  ;;  %3290 = vrcp.f32 %v310_v21 }
 0x1fe   :  { %2873 = vmatpush3.xpose.msk.msra.mxu0 %vm68_vm0, %v3521_v50  ;;  %v3527_v52 = vpop.permute.xlu0 %544  ;;  %3292 = vrcp.f32 %v309_v25  ;;  %v437_v25 = vld [vmem:[#allocation7 + $0x268] sm:$0xff] }
 0x1ff   :  { %2874 = vmatprep.subr.msk.mxu0 %vm68_vm0, %v3527_v52 }
 0x200   :  { %228 = vmin.xlane.f32.xlu1 %v227_v51  ;;  %v3531_v53 = vpop.permute.xlu1 %542 }
 0x202   :  { %2875 = vmatpush3.xpose.msk.msra.mxu0 %vm68_vm0, %v3527_v52 }
 0x203   :  { %2876 = vmatprep.subr.msk.mxu0 %vm68_vm0, %v3531_v53 }
 0x206   :  { %2877 = vmatpush3.xpose.msk.msra.mxu0 %vm68_vm0, %v3531_v53  ;;  %v3573_v24 = vpop.permute.xlu0 %266 }
 0x209   :  { %2879 = vmatmul.mubr.msk.f32.vlgmr.msra.gmra.mxu0 %vm68_vm0, %v3461_v5 }
 0x20a   :  { %2881 = vmatprep.mubr.msk.f32.mxu0 %vm68_vm0, %v3463_v6  ;;  %v3291_v37 = vpop.eup %3290 }
 0x20b   :  { %v318_v46 = vmul.f32 %v3291_v37, %v3484_v20  ;;  %v3293_v47 = vpop.eup %3292 }
 0x20c   :  { %v317_v58 = vmul.f32 %v3293_v47, %v3479_v18 }
 0x20d   :  { %2882 = vmatmul.mubr.msk.f32.gmra.mxu0 %vm68_vm0, %v3469_v7 }
 0x211   :  { %270 = vperm.xlu1 %3289, %v3461_v5   ;;  %v226_v5 = vcvt.s32.f32 %v224_v2  ;;  %v441_v2 = vld [vmem:[#allocation7 + $0x288] sm:$0xff] }
 0x231   :  { %v3546_v54 = vpop.xlane.xlu1 %307 }
 0x232   :  { %v312_v32 = vmax.f32 %v3546_v54, 1.0 }
 0x233   :  { %v305_v26 = vpop.xlane.xlu0 %304 }
 0x234   :  { %v311_v30 = vmax.f32 %v305_v26, 1.0  ;;  %v436_v26 = vld [vmem:[#allocation7 + $0x260] sm:$0xff] }
 0x236   :  { %3294 = vrcp.f32 %v311_v30  ;;  %v433_v30 = vld [vmem:[#allocation7 + $0x248] sm:$0xff] }
 0x237   :  { %3296 = vrcp.f32 %v312_v32  ;;  %v431_v32 = vld [vmem:[#allocation7 + $0x238] sm:$0xff] }
 0x27d   :  { %v214_v56 = vpop.xlane.xlu1 %213 }
 0x27e   :  { %vm215_vm10 = vcmp.eq.f32.partialorder %v212_v35, %v214_v56  ;;  %v220_v29 = vcvt.f32.s32 %v214_v56 }
 0x27f   :  { %v216_v59 = vsel %vm215_vm10, %v211_v57, inf }
 0x280   :  { %217 = vmin.xlane.f32.xlu1 %v216_v59  ;;  %v221_v33 = vshll.u32 %v220_v29, 16  ;;  %v434_v29 = vld [vmem:[#allocation7 + $0x250] sm:$0xff] }
 0x281   :  { %v199_v60 = vpop.xlane.xlu1 %198 }
 0x282   :  { %vm200_vm11 = vcmp.eq.f32.partialorder %v197_v42, %v199_v60  ;;  %v205_v34 = vcvt.f32.s32 %v199_v60 }
 0x283   :  { %v201_v63 = vsel %vm200_vm11, %v196_v61, inf }
 0x284   :  { %202 = vmin.xlane.f32.xlu0 %v201_v63  ;;  %v206_v39 = vshll.u32 %v205_v34, 16 }
 0x285   :  { %v3548_v0 = vpop.xlane.xlu1 %243 }
 0x286   :  { %vm245_vm12 = vcmp.eq.f32.partialorder %v242_v48, %v3548_v0  ;;  %v250_v42 = vcvt.f32.s32 %v3548_v0  ;;  %v442_v0 = vld [vmem:[#allocation7 + $0x290] sm:$0xff] }
 0x287   :  { %v246_v3 = vsel %vm245_vm12, %v241_v1, inf  ;;  %v3295_v1 = vpop.eup %3294 }
 0x288   :  { %247 = vmin.xlane.f32.xlu0 %v246_v3  ;;  %v251_v56 = vshll.u32 %v250_v42, 16  ;;  %v3297_v3 = vpop.eup %3296 }
 0x289   :  { %v3551_v4 = vpop.xlane.xlu1 %228 }
 0x28a   :  { %vm230_vm13 = vcmp.eq.f32.partialorder %v227_v51, %v3551_v4  ;;  %v235_v49 = vcvt.f32.s32 %v3551_v4 }
 0x28b   :  { %v231_v8 = vsel %vm230_vm13, %v226_v5, inf }
 0x28c   :  { %232 = vmin.xlane.f32.xlu0 %v231_v8  ;;  %v236_v60 = vshll.u32 %v235_v49, 16  ;;  %v319_v8 = vmul.f32 %v3295_v1, %v3495_v23  ;;  %v438_v23 = vld [vmem:[#allocation7 + $0x270] sm:$0xff] }
 0x28d   :  { %v3576_v28 = vpop.permute.xlu1 %270 }
 0x291   :  { %274 = vperm.xlu1 %3289, %v3463_v6  }
 0x2a2   :  { %278 = vperm.xlu0 %3288, %v3469_v7  }
 0x2c9   :  { %v3556_v11 = vpop.f32.mrf.mxu0 }
 0x2ca   :  { %v647_v12 = vsel %vm643_vm14, %v3556_v11, inf  ;;  %vm741_vm9 = vcmp.le.f32.partialorder %v3556_v11, 1.0 }
 0x2cb   :  { %648 = vmin.xlane.f32.xlu0 %v647_v12  ;;  %v3560_v13 = vpop.f32.mrf.mxu0 }
 0x2cc   :  { %v644_v6 = vsel %vm643_vm14, %v3560_v13, inf  ;;  %vm740_vm8 = vcmp.le.f32.partialorder %v3560_v13, 1.0 }
 0x2cd   :  { %645 = vmin.xlane.f32.xlu1 %v644_v6  ;;  %v3564_v14 = vpop.f32.mrf.mxu0  ;;  %v320_v6 = vmul.f32 %v3297_v3, %v3492_v22  ;;  %v435_v22 = vld [vmem:[#allocation7 + $0x258] sm:$0xff] }
 0x2ce   :  { %v653_v16 = vsel %vm643_vm14, %v3564_v14, inf  ;;  %vm743_vm10 = vcmp.le.f32.partialorder %v3564_v14, 1.0 }
 0x2cf   :  { %v3566_v15 = vpop.f32.mrf.mxu0 }
 0x2d0   :  { %v650_v7 = vsel %vm643_vm14, %v3566_v15, inf  ;;  %vm742_vm12 = vcmp.le.f32.partialorder %v3566_v15, 1.0 }
 0x2d1   :  { %651 = vmin.xlane.f32.xlu0 %v650_v7 }
 0x2d5   :  { %654 = vmin.xlane.f32.xlu0 %v653_v16 }
 0x309   :  { %v218_v31 = vpop.xlane.xlu1 %217 }
 0x30a   :  { %v219_v35 = vcvt.f32.s32 %v218_v31  ;;  %v432_v31 = vld [vmem:[#allocation7 + $0x240] sm:$0xff] }
 0x30c   :  { %v222_v36 = vadd.s32 %v221_v33, %v219_v35 }
 0x30d   :  { %v203_v38 = vpop.xlane.xlu0 %202  ;;  %v3593_v18 = vpop.permute.xlu1 %274 }
 0x30e   :  { %vm254_vm15 = vcmp.eq.s32.totalorder %v3501_v27, %v222_v36  ;;  %v204_v40 = vcvt.f32.s32 %v203_v38 }
 0x30f   :  { %v2480_v41 = vsel %vm254_vm15, 1.0, %v3415_v17 }
 0x310   :  { %v282_v43 = vmul.f32 %v2480_v41, %v3576_v28  ;;  %v207_v44 = vadd.s32 %v206_v39, %v204_v40  ;;  %v430_v40 = vld [vmem:[#allocation7 + $0x230] sm:$0xff] }
 0x311   :  { %v248_v48 = vpop.xlane.xlu0 %247 }
 0x312   :  { %vm253_vm2 = vcmp.eq.s32.totalorder %v3501_v27, %v207_v44  ;;  %v249_v51 = vcvt.f32.s32 %v248_v48  ;;  %v322_v54 = vadd.f32 %v318_v46, %v282_v43  ;;  %v429_v44 = vld [vmem:[#allocation7 + $0x228] sm:$0xff]  ;;  %v428_v48 = vld [vmem:[#allocation7 + $0x220] sm:$0xff] }
 0x313   :  { %v2479_v55 = vsel %vm253_vm2, 1.0, %v3415_v17 }
 0x314   :  { %v281_v57 = vmul.f32 %v2479_v55, %v3573_v24  ;;  %v252_v61 = vadd.s32 %v251_v56, %v249_v51 }
 0x315   :  { %v233_v59 = vpop.xlane.xlu0 %232 }
 0x316   :  { %v234_v62 = vcvt.f32.s32 %v233_v59  ;;  %v321_v20 = vadd.f32 %v317_v58, %v281_v57  ;;  %vm256_vm3 = vcmp.eq.s32.totalorder %v3501_v27, %v252_v61  ;;  %v3619_v58 = vsel %vm740_vm8, 1.0, %v3415_v17 }
 0x317   :  { %v2482_v10 = vsel %vm256_vm3, 1.0, %v3415_v17  ;;  %v752_v61 = vsel %vm643_vm14, %v3619_v58, 0.0 }
 0x318   :  { %v237_v63 = vadd.s32 %v236_v60, %v234_v62  ;;  %2826 = vmatprep.mubr.msk.f32.mxu1 %vm172_vm1, %v321_v20 }
 0x319   :  { %2827 = vmatmul.mubr.msk.f32.vlgmr.msra.gmra.mxu1 %vm172_vm1, %v322_v54 }
 0x31a   :  { %vm255_vm4 = vcmp.eq.s32.totalorder %v3501_v27, %v237_v63  ;;  %2833 = vmatpush3.msra.mxu1 %v443_v19  ;;  %v439_v19 = vld [vmem:[#allocation7 + $0x278] sm:$0xff] }
 0x31b   :  { %v2481_v4 = vsel %vm255_vm4, 1.0, %v3415_v17  ;;  %2834 = vmatprep.subr.mxu1 %v442_v0 }
 0x31c   :  { %v283_v5 = vmul.f32 %v2481_v4, %v3593_v18  ;;  %2835 = vmatpush3.msra.mxu1 %v442_v0 }
 0x31d   :  { %v3599_v12 = vpop.permute.xlu0 %278  ;;  %2836 = vmatprep.subr.mxu1 %v441_v2 }
 0x31e   :  { %v284_v7 = vmul.f32 %v2482_v10, %v3599_v12  ;;  %v323_v16 = vadd.f32 %v319_v8, %v283_v5  ;;  %2837 = vmatpush3.msra.mxu1 %v441_v2 }
 0x31f   :  { %2838 = vmatprep.subr.mxu1 %v440_v9 }
 0x320   :  { %v324_v21 = vadd.f32 %v320_v6, %v284_v7  ;;  %2829 = vmatprep.mubr.msk.f32.mxu1 %vm172_vm1, %v323_v16  ;;  %2839 = vmatpush3.msra.mxu1 %v440_v9 }
 0x321   :  { %2840 = vmatprep.subr.mxu1 %v439_v19 }
 0x322   :  { %2830 = vmatmul.mubr.msk.f32.gmra.mxu1 %vm172_vm1, %v324_v21 }
 0x323   :  { %2841 = vmatpush3.msra.mxu1 %v439_v19  ;;  %v3638_v19 = vsel %vm743_vm10, 1.0, %v3415_v17 }
 0x324   :  { %2842 = vmatprep.subr.mxu1 %v438_v23 }
 0x325   :  { %2843 = vmatpush3.msra.mxu1 %v438_v23 }
 0x326   :  { %2844 = vmatprep.subr.mxu1 %v437_v25 }
 0x327   :  { %2845 = vmatpush3.msra.mxu1 %v437_v25  ;;  %v761_v25 = vsel %vm643_vm14, %v3638_v19, 0.0 }
 0x328   :  { %2846 = vmatprep.subr.mxu1 %v436_v26 }
 0x329   :  { %2847 = vmatpush3.msra.mxu1 %v436_v26 }
 0x32a   :  { %2848 = vmatprep.subr.mxu1 %v435_v22 }
 0x32b   :  { %2849 = vmatpush3.msra.mxu1 %v435_v22 }
 0x32c   :  { %2850 = vmatprep.subr.mxu1 %v434_v29 }
 0x32d   :  { %2851 = vmatpush3.msra.mxu1 %v434_v29 }
 0x32e   :  { %2852 = vmatprep.subr.mxu1 %v433_v30 }
 0x32f   :  { %2853 = vmatpush3.msra.mxu1 %v433_v30 }
 0x330   :  { %2854 = vmatprep.subr.mxu1 %v432_v31 }
 0x331   :  { %2855 = vmatpush3.msra.mxu1 %v432_v31 }
 0x332   :  { %2856 = vmatprep.subr.mxu1 %v431_v32 }
 0x333   :  { %2857 = vmatpush3.msra.mxu1 %v431_v32 }
 0x334   :  { %2858 = vmatprep.subr.mxu1 %v430_v40 }
 0x335   :  { %2859 = vmatpush3.msra.mxu1 %v430_v40  ;;  %v1001_v40 = vld [vmem:[#allocation7 + $0x1e8] sm:$0xff] }
 0x336   :  { %2860 = vmatprep.subr.mxu1 %v429_v44 }
 0x337   :  { %2861 = vmatpush3.msra.mxu1 %v429_v44  ;;  %v998_v44 = vld [vmem:[#allocation7 + $0x1d0] sm:$0xff] }
 0x338   :  { %2862 = vmatprep.subr.mxu1 %v428_v48 }
 0x339   :  { %2863 = vmatpush3.msra.mxu1 %v428_v48  ;;  %v996_v48 = vld [vmem:[#allocation7 + $0x1c0] sm:$0xff] }
 0x354   :  { %v649_v33 = vpop.xlane.xlu0 %648 }
 0x355   :  { %vm657_vm1 = vcmp.le.f32.partialorder %v3556_v11, %v649_v33 }
 0x356   :  { %v661_v34 = vsel %vm657_vm1, %v3501_v27, 32  ;;  %v646_v35 = vpop.xlane.xlu1 %645 }
 0x357   :  { %v679_v36 = vsel %vm643_vm14, %v661_v34, 2147483647  ;;  %vm656_vm5 = vcmp.le.f32.partialorder %v3560_v13, %v646_v35  ;;  %v3625_v13 = vsel %vm741_vm9, 1.0, %v3415_v17  ;;  %v3653_v34 = vld [vmem:[#allocation5 + $0x40] sm:$0xff] }
 0x358   :  { %v660_v37 = vsel %vm656_vm5, %v3501_v27, 32  ;;  %v681_v38 = vshra.s32 %v679_v36, 16  ;;  %v755_v62 = vsel %vm643_vm14, %v3625_v13, 0.0  ;;  %v680_v11 = vand.u32 65535, %v679_v36  ;;  %v1006_v35 = vld [vmem:[#allocation7 + $0x210] sm:$0xff]  ;;  %v1005_v36 = vld [vmem:[#allocation7 + $0x208] sm:$0xff] }
 0x359   :  { %v664_v39 = vsel %vm643_vm14, %v660_v37, 2147483647  ;;  %2936 = vmatprep.subr.mxu1 %v1006_v35  ;;  %v1004_v37 = vld [vmem:[#allocation7 + $0x200] sm:$0xff] }
 0x35a   :  { %v652_v41 = vpop.xlane.xlu0 %651  ;;  %v683_v42 = vcvt.s32.f32 %v681_v38  ;;  %v666_v43 = vshra.s32 %v664_v39, 16  ;;  %v665_v3 = vand.u32 65535, %v664_v39  ;;  %v682_v9 = vcvt.s32.f32 %v680_v11  ;;  %v1003_v38 = vld [vmem:[#allocation7 + $0x1f8] sm:$0xff]  ;;  %v1002_v39 = vld [vmem:[#allocation7 + $0x1f0] sm:$0xff] }
 0x35b   :  { %vm658_vm6 = vcmp.le.f32.partialorder %v3566_v15, %v652_v41  ;;  %v1000_v41 = vld [vmem:[#allocation7 + $0x1e0] sm:$0xff] }
 0x35c   :  { %v662_v46 = vsel %vm658_vm6, %v3501_v27, 32  ;;  %684 = vmin.xlane.f32.xlu0 %v683_v42  ;;  %v668_v47 = vcvt.s32.f32 %v666_v43  ;;  %v667_v16 = vcvt.s32.f32 %v665_v3 }
 0x35d   :  { %v694_v49 = vsel %vm643_vm14, %v662_v46, 2147483647  ;;  %v997_v46 = vld [vmem:[#allocation7 + $0x1c8] sm:$0xff] }
 0x35e   :  { %669 = vmin.xlane.f32.xlu1 %v668_v47  ;;  %v655_v51 = vpop.xlane.xlu0 %654  ;;  %v696_v54 = vshra.s32 %v694_v49, 16  ;;  %v695_v26 = vand.u32 65535, %v694_v49 }
 0x35f   :  { %vm659_vm7 = vcmp.le.f32.partialorder %v3564_v14, %v655_v51  ;;  %v3641_v14 = vsel %vm742_vm12, 1.0, %v3415_v17 }
 0x360   :  { %v663_v55 = vsel %vm659_vm7, %v3501_v27, 32  ;;  %v698_v56 = vcvt.s32.f32 %v696_v54  ;;  %v758_v15 = vsel %vm643_vm14, %v3641_v14, 0.0  ;;  %v697_v30 = vcvt.s32.f32 %v695_v26 }
 0x361   :  { %v709_v57 = vsel %vm643_vm14, %v663_v55, 2147483647 }
 0x362   :  { %699 = vmin.xlane.f32.xlu1 %v698_v56  ;;  %v711_v59 = vshra.s32 %v709_v57, 16  ;;  %v710_v22 = vand.u32 65535, %v709_v57 }
 0x364   :  { %v713_v60 = vcvt.s32.f32 %v711_v59  ;;  %v712_v31 = vcvt.s32.f32 %v710_v22 }
 0x366   :  { %753 = vadd.xlane.f32.xlu1 %v752_v61  ;;  %714 = vmin.xlane.f32.xlu0 %v713_v60 }
 0x36a   :  { %756 = vadd.xlane.f32.xlu0 %v755_v62 }
 0x3d9   :  { %v2828_v20 = vpop.f32.mrf.mxu1 }
 0x3da   :  { %v425_v1 = vmax.f32 %v2828_v20, 0.0 }
 0x3db   :  { %v405_v63 = vpop.f32.mrf.mxu1 }
 0x3dc   :  { %v424_v0 = vmax.f32 %v405_v63, 0.0 }
 0x3de   :  { %2864 = vmatprep.mubr.f32.mxu1 %v424_v0 }
 0x3df   :  { %2865 = vmatmul.mubr.f32.vlgmr.msra.gmra.mxu1 %v425_v1 }
 0x3e0   :  { %2937 = vmatpush3.msra.mxu1 %v1006_v35 }
 0x3e1   :  { %2938 = vmatprep.subr.mxu1 %v1005_v36 }
 0x3e2   :  { %v2831_v2 = vpop.f32.mrf.mxu1  ;;  %2939 = vmatpush3.msra.mxu1 %v1005_v36  ;;  %v3668_v36 = vld [vmem:[#allocation5 + $0x50] sm:$0xff] }
 0x3e3   :  { %v427_v10 = vmax.f32 %v2831_v2, 0.0  ;;  %2940 = vmatprep.subr.mxu1 %v1004_v37 }
 0x3e4   :  { %v415_v4 = vpop.f32.mrf.mxu1  ;;  %2941 = vmatpush3.msra.mxu1 %v1004_v37 }
 0x3e5   :  { %v426_v5 = vmax.f32 %v415_v4, 0.0  ;;  %v3629_v8 = vpop.xlane.xlu0 %684  ;;  %2942 = vmatprep.subr.mxu1 %v1003_v38 }
 0x3e6   :  { %vm686_vm11 = vcmp.eq.f32.partialorder %v683_v42, %v3629_v8  ;;  %2943 = vmatpush3.msra.mxu1 %v1003_v38  ;;  %v999_v42 = vld [vmem:[#allocation7 + $0x1d8] sm:$0xff]  ;;  %v691_v3 = vcvt.f32.s32 %v3629_v8  ;;  %v2491_v8 = vld [vmem:[#allocation7 + $0x2a0] ss:$0 sm:$0xff] }
 0x3e7   :  { %v3633_v6 = vpop.xlane.xlu1 %669  ;;  %2867 = vmatprep.mubr.f32.mxu1 %v426_v5  ;;  %v687_v7 = vsel %vm686_vm11, %v682_v9, inf  ;;  %2944 = vmatprep.subr.mxu1 %v1002_v39 }
 0x3e8   :  { %2868 = vmatmul.mubr.f32.gmra.mxu1 %v427_v10  ;;  %688 = vmin.xlane.f32.xlu0 %v687_v7  ;;  %vm671_vm13 = vcmp.eq.f32.partialorder %v668_v47, %v3633_v6  ;;  %v676_v49 = vcvt.f32.s32 %v3633_v6 }
 0x3e9   :  { %v672_v21 = vsel %vm671_vm13, %v667_v16, inf  ;;  %2968 = vmatprep.mubr.f32.mxu1 %v3653_v34  ;;  %2945 = vmatpush3.msra.mxu1 %v1002_v39 }
 0x3ea   :  { %673 = vmin.xlane.f32.xlu1 %v672_v21  ;;  %2946 = vmatprep.subr.mxu1 %v1001_v40  ;;  %v677_v54 = vshll.u32 %v676_v49, 16 }
 0x3eb   :  { %v3643_v23 = vpop.xlane.xlu1 %699  ;;  %2947 = vmatpush3.msra.mxu1 %v1001_v40 }
 0x3ec   :  { %762 = vadd.xlane.f32.xlu0 %v761_v25  ;;  %vm701_vm15 = vcmp.eq.f32.partialorder %v698_v56, %v3643_v23  ;;  %2948 = vmatprep.subr.mxu1 %v1000_v41  ;;  %v706_v10 = vcvt.f32.s32 %v3643_v23 }
 0x3ed   :  { %v702_v32 = vsel %vm701_vm15, %v697_v30, inf  ;;  %2949 = vmatpush3.msra.mxu1 %v1000_v41  ;;  %v3673_v41 = vld [vmem:[#allocation5 + $0x48] sm:$0xff] }
 0x3ee   :  { %759 = vadd.xlane.f32.xlu1 %v758_v15  ;;  %2950 = vmatprep.subr.mxu1 %v999_v42  ;;  %v707_v26 = vshll.u32 %v706_v10, 16  ;;  %v884_v10 = vld [vmem:[#allocation7 + $0x128] sm:$0xff] }
 0x3ef   :  { %v3650_v29 = vpop.xlane.xlu0 %714  ;;  %v754_v43 = vpop.xlane.xlu1 %753  ;;  %2951 = vmatpush3.msra.mxu1 %v999_v42 }
 0x3f0   :  { %vm716_vm2 = vcmp.eq.f32.partialorder %v713_v60, %v3650_v29  ;;  %v764_v47 = vmax.f32 %v754_v43, 1.0  ;;  %2952 = vmatprep.subr.mxu1 %v998_v44  ;;  %v721_v21 = vcvt.f32.s32 %v3650_v29 }
 0x3f1   :  { %v717_v33 = vsel %vm716_vm2, %v712_v31, inf  ;;  %2953 = vmatpush3.msra.mxu1 %v998_v44 }
 0x3f2   :  { %703 = vmin.xlane.f32.xlu1 %v702_v32  ;;  %718 = vmin.xlane.f32.xlu0 %v717_v33  ;;  %3298 = vrcp.f32 %v764_v47  ;;  %v3665_v32 = vld [vmem:[#allocation5 + $0x58] sm:$0xff]  ;;  %v722_v33 = vshll.u32 %v721_v21, 16  ;;  %v994_v21 = vld [vmem:[#allocation7 + $0x1b0] sm:$0xff] }
 0x3f3   :  { %2954 = vmatprep.subr.mxu1 %v997_v46  ;;  %v757_v20 = vpop.xlane.xlu0 %756 }
 0x3f4   :  { %2955 = vmatpush3.msra.mxu1 %v997_v46  ;;  %v765_v2 = vmax.f32 %v757_v20, 1.0 }
 0x3f5   :  { %2956 = vmatprep.subr.mxu1 %v996_v48 }
 0x3f6   :  { %2957 = vmatpush3.msra.mxu1 %v996_v48 }
 0x3ff   :  { %v3299_v57 = vpop.eup %3298 }
 0x400   :  { %v772_v61 = vmul.f32 %v3299_v57, %v3619_v58  ;;  %v692_v58 = vshll.u32 %v691_v3, 16  ;;  %v888_v3 = vld [vmem:[#allocation7 + $0x148] sm:$0xff] }
 0x471   :  { %v689_v63 = vpop.xlane.xlu0 %688 }
 0x472   :  { %v690_v5 = vcvt.f32.s32 %v689_v63  ;;  %v895_v63 = vld [vmem:[#allocation7 + $0x180] sm:$0xff] }
 0x473   :  { %v674_v51 = vpop.xlane.xlu1 %673 }
 0x474   :  { %v675_v55 = vcvt.f32.s32 %v674_v51  ;;  %v693_v25 = vadd.s32 %v692_v58, %v690_v5  ;;  %v886_v5 = vld [vmem:[#allocation7 + $0x138] sm:$0xff] }
 0x475   :  { %v763_v1 = vpop.xlane.xlu0 %762  ;;  %v882_v58 = vld [vmem:[#allocation7 + $0x118] sm:$0xff] }
 0x476   :  { %v678_v56 = vadd.s32 %v677_v54, %v675_v55  ;;  %v767_v4 = vmax.f32 %v763_v1, 1.0  ;;  %vm725_vm4 = vcmp.eq.s32.totalorder %v3501_v27, %v693_v25  ;;  %v891_v1 = vld [vmem:[#allocation7 + $0x160] sm:$0xff]  ;;  %v993_v25 = vld [vmem:[#allocation7 + $0x1a8] sm:$0xff] }
 0x477   :  { %v760_v0 = vpop.xlane.xlu1 %759  ;;  %v2501_v40 = vsel %vm725_vm4, 1.0, %v3415_v17 }
 0x478   :  { %vm724_vm3 = vcmp.eq.s32.totalorder %v3501_v27, %v678_v56  ;;  %v766_v11 = vmax.f32 %v760_v0, 1.0  ;;  %v737_v47 = vmul.f32 %v2501_v40, %v3576_v28  ;;  %v893_v0 = vld [vmem:[#allocation7 + $0x170] sm:$0xff] }
 0x479   :  { %v2500_v59 = vsel %vm724_vm3, 1.0, %v3415_v17 }
 0x47a   :  { %v736_v60 = vmul.f32 %v2500_v59, %v3573_v24  ;;  %3300 = vrcp.f32 %v766_v11  ;;  %v890_v11 = vld [vmem:[#allocation7 + $0x158] sm:$0xff] }
 0x47b   :  { %3302 = vrcp.f32 %v765_v2  ;;  %v704_v9 = vpop.xlane.xlu1 %703  ;;  %v719_v16 = vpop.xlane.xlu0 %718  ;;  %v889_v2 = vld [vmem:[#allocation7 + $0x150] sm:$0xff] }
 0x47c   :  { %v776_v62 = vadd.f32 %v772_v61, %v736_v60  ;;  %3304 = vrcp.f32 %v767_v4  ;;  %v705_v7 = vcvt.f32.s32 %v704_v9  ;;  %v720_v15 = vcvt.f32.s32 %v719_v16  ;;  %v896_v60 = vld [vmem:[#allocation7 + $0x188] sm:$0xff]  ;;  %v887_v4 = vld [vmem:[#allocation7 + $0x140] sm:$0xff]  ;;  %v885_v9 = vld [vmem:[#allocation7 + $0x130] sm:$0xff] }
 0x47d   :  { %v995_v16 = vld [vmem:[#allocation7 + $0x1b8] sm:$0xff] }
 0x47e   :  { %2892 = vmatprep.mubr.msk.f32.mxu0 %vm643_vm14, %v776_v62  ;;  %v708_v30 = vadd.s32 %v707_v26, %v705_v7  ;;  %v723_v37 = vadd.s32 %v722_v33, %v720_v15  ;;  %v881_v7 = vld [vmem:[#allocation7 + $0x110] sm:$0xff]  ;;  %2958 = vmatprep.subr.mxu1 %v995_v16  ;;  %v992_v26 = vld [vmem:[#allocation7 + $0x1a0] sm:$0xff] }
 0x47f   :  { %2959 = vmatpush3.msra.mxu1 %v995_v16 }
 0x480   :  { %vm726_vm1 = vcmp.eq.s32.totalorder %v3501_v27, %v708_v30  ;;  %vm727_vm5 = vcmp.eq.s32.totalorder %v3501_v27, %v723_v37  ;;  %2960 = vmatprep.subr.mxu1 %v994_v21 }
 0x481   :  { %v2502_v48 = vsel %vm726_vm1, 1.0, %v3415_v17  ;;  %v2503_v59 = vsel %vm727_vm5, 1.0, %v3415_v17  ;;  %2961 = vmatpush3.msra.mxu1 %v994_v21 }
 0x482   :  { %v738_v57 = vmul.f32 %v2502_v48, %v3593_v18  ;;  %2962 = vmatprep.subr.mxu1 %v993_v25 }
 0x483   :  { %2963 = vmatpush3.msra.mxu1 %v993_v25 }
 0x484   :  { %2964 = vmatprep.subr.mxu1 %v992_v26 }
 0x485   :  { %2965 = vmatpush3.msra.mxu1 %v992_v26 }
 0x487   :  { %v3301_v42 = vpop.eup %3300 }
 0x488   :  { %v3303_v46 = vpop.eup %3302  ;;  %v774_v54 = vmul.f32 %v3301_v42, %v3641_v14  ;;  %v739_v14 = vmul.f32 %v2503_v59, %v3599_v12 }
 0x489   :  { %v3305_v51 = vpop.eup %3304  ;;  %v773_v55 = vmul.f32 %v3303_v46, %v3625_v13  ;;  %v894_v13 = vld [vmem:[#allocation7 + $0x178] sm:$0xff] }
 0x48a   :  { %v775_v62 = vmul.f32 %v3305_v51, %v3638_v19  ;;  %v778_v20 = vadd.f32 %v774_v54, %v738_v57  ;;  %v892_v19 = vld [vmem:[#allocation7 + $0x168] sm:$0xff] }
 0x48b   :  { %v777_v61 = vadd.f32 %v773_v55, %v737_v47 }
 0x49f   :  { %v2866_v6 = vpop.f32.mrf.mxu1 }
 0x4a0   :  { %v521_v38 = vadd.f32 %v2866_v6, %v2491_v8  ;;  %v883_v6 = vld [vmem:[#allocation7 + $0x120] sm:$0xff] }
 0x4a1   :  { %v515_v22 = vpop.f32.mrf.mxu1 }
 0x4a2   :  { %v516_v43 = vadd.f32 %v2491_v8, %v515_v22  ;;  %v539_v49 = vadd.f32 %v3673_v41, %v521_v38  ;;  %v991_v22 = vld [vmem:[#allocation7 + $0x198] sm:$0xff]  ;;  %v1105_v38 = vld [vmem:[#allocation2] sm:$0xff] }
 0x4a3   :  { %2966 = vmatprep.subr.mxu1 %v991_v22 }
 0x4a4   :  { %v538_v56 = vadd.f32 %v3653_v34, %v516_v43  ;;  %v779_v34 = vadd.f32 %v775_v62, %v739_v14  ;;  %2967 = vmatpush3.msra.mxu1 %v991_v22  ;;  %v2513_v62 = vld [vmem:[#allocation7 + $0x218] ss:$0 sm:$0xff] }
 0x4a5   :  { %2969 = vmatmul.mubr.f32.vlgmr.msra.gmra.mxu1 %v3673_v41  ;;  %v2512_v41 = vld [vmem:[#allocation7 + $0x190] ss:$0 sm:$0xff] }
 0x4a6   :  { %2971 = vmatprep.mubr.f32.mxu1 %v3668_v36 }
 0x4a8   :  { %v2869_v31 = vpop.f32.mrf.mxu1 }
 0x4a9   :  { %v531_v23 = vadd.f32 %v2869_v31, %v2491_v8  ;;  %2972 = vmatmul.mubr.f32.gmra.mxu1 %v3665_v32 }
 0x4aa   :  { %v525_v35 = vpop.f32.mrf.mxu1 }
 0x4ab   :  { %v541_v29 = vadd.f32 %v3665_v32, %v531_v23  ;;  %v526_v39 = vadd.f32 %v2491_v8, %v525_v35  ;;  %v1107_v32 = vld [vmem:[#allocation2 + $0x10] sm:$0xff] }
 0x4ad   :  { %v540_v44 = vadd.f32 %v3668_v36, %v526_v39  ;;  %2884 = vmatprep.subr.mxu0 %v541_v29  ;;  %v1109_v36 = vld [vmem:[#allocation2 + $0x20] sm:$0xff]  ;;  %v1112_v39 = vld [vmem:[#allocation2 + $0x38] sm:$0xff] }
 0x4ae   :  { %2885 = vmatpush3.msra.mxu0 %v541_v29  ;;  %v1110_v29 = vld [vmem:[#allocation2 + $0x28] sm:$0xff] }
 0x4af   :  { %2886 = vmatprep.subr.mxu0 %v540_v44 }
 0x4b0   :  { %2887 = vmatpush3.msra.mxu0 %v540_v44 }
 0x4b1   :  { %2888 = vmatprep.subr.mxu0 %v539_v49 }
 0x4b2   :  { %2889 = vmatpush3.msra.mxu0 %v539_v49 }
 0x4b3   :  { %2890 = vmatprep.subr.mxu0 %v538_v56 }
 0x4b4   :  { %2891 = vmatpush3.msra.mxu0 %v538_v56 }
 0x4b5   :  { %2893 = vmatmul.mubr.msk.f32.vlgmr.msra.gmra.mxu0 %vm643_vm14, %v777_v61  ;;  %2898 = vmatprep.subr.mxu0 %v896_v60 }
 0x4b6   :  { %2895 = vmatprep.mubr.msk.f32.mxu0 %vm643_vm14, %v778_v20  ;;  %2899 = vmatpush3.msra.mxu0 %v896_v60 }
 0x4b7   :  { %2900 = vmatprep.subr.mxu0 %v895_v63 }
 0x4b8   :  { %2901 = vmatpush3.msra.mxu0 %v895_v63 }
 0x4b9   :  { %2896 = vmatmul.mubr.msk.f32.gmra.mxu0 %vm643_vm14, %v779_v34  ;;  %2902 = vmatprep.subr.mxu0 %v894_v13 }
 0x4ba   :  { %2903 = vmatpush3.msra.mxu0 %v894_v13 }
 0x4bb   :  { %2904 = vmatprep.subr.mxu0 %v893_v0 }
 0x4bc   :  { %2905 = vmatpush3.msra.mxu0 %v893_v0 }
 0x4bd   :  { %2906 = vmatprep.subr.mxu0 %v892_v19 }
 0x4be   :  { %2907 = vmatpush3.msra.mxu0 %v892_v19 }
 0x4bf   :  { %2908 = vmatprep.subr.mxu0 %v891_v1 }
 0x4c0   :  { %2909 = vmatpush3.msra.mxu0 %v891_v1 }
 0x4c1   :  { %2910 = vmatprep.subr.mxu0 %v890_v11 }
 0x4c2   :  { %2911 = vmatpush3.msra.mxu0 %v890_v11 }
 0x4c3   :  { %2912 = vmatprep.subr.mxu0 %v889_v2 }
 0x4c4   :  { %2913 = vmatpush3.msra.mxu0 %v889_v2 }
 0x4c5   :  { %2914 = vmatprep.subr.mxu0 %v888_v3 }
 0x4c6   :  { %2915 = vmatpush3.msra.mxu0 %v888_v3 }
 0x4c7   :  { %2916 = vmatprep.subr.mxu0 %v887_v4 }
 0x4c8   :  { %2917 = vmatpush3.msra.mxu0 %v887_v4 }
 0x4c9   :  { %2918 = vmatprep.subr.mxu0 %v886_v5 }
 0x4ca   :  { %2919 = vmatpush3.msra.mxu0 %v886_v5 }
 0x4cb   :  { %2920 = vmatprep.subr.mxu0 %v885_v9 }
 0x4cc   :  { %2921 = vmatpush3.msra.mxu0 %v885_v9 }
 0x4cd   :  { %2922 = vmatprep.subr.mxu0 %v884_v10 }
 0x4ce   :  { %2923 = vmatpush3.msra.mxu0 %v884_v10 }
 0x4cf   :  { %2924 = vmatprep.subr.mxu0 %v883_v6 }
 0x4d0   :  { %2925 = vmatpush3.msra.mxu0 %v883_v6 }
 0x4d1   :  { %2926 = vmatprep.subr.mxu0 %v882_v58 }
 0x4d2   :  { %2927 = vmatpush3.msra.mxu0 %v882_v58 }
 0x4d3   :  { %2928 = vmatprep.subr.mxu0 %v881_v7 }
 0x4d4   :  { %2929 = vmatpush3.msra.mxu0 %v881_v7 }
 0x4d5   :  { %2974 = vmatprep.subr.msk.mxu0 %vm68_vm0, %v3513_v45 }
 0x575   :  { %v2894_v15 = vpop.f32.mrf.mxu0 }
 0x576   :  { %v878_v31 = vmax.f32 %v2894_v15, 0.0 }
 0x577   :  { %v858_v30 = vpop.f32.mrf.mxu0 }
 0x578   :  { %v877_v8 = vmax.f32 %v858_v30, 0.0 }
 0x579   :  { %v2897_v33 = vpop.f32.mrf.mxu0 }
 0x57a   :  { %2930 = vmatprep.mubr.f32.mxu0 %v877_v8  ;;  %v880_v37 = vmax.f32 %v2897_v33, 0.0 }
 0x57b   :  { %v868_v23 = vpop.f32.mrf.mxu0  ;;  %2931 = vmatmul.mubr.f32.vlgmr.msra.gmra.mxu0 %v878_v31 }
 0x57c   :  { %v879_v35 = vmax.f32 %v868_v23, 0.0  ;;  %2975 = vmatpush3.xpose.msk.msra.mxu0 %vm68_vm0, %v3513_v45  ;;  %v1106_v45 = vld [vmem:[#allocation2 + $0x8] sm:$0xff] }
 0x57d   :  { %2976 = vmatprep.subr.msk.mxu0 %vm68_vm0, %v3521_v50 }
 0x57e   :  { %2933 = vmatprep.mubr.f32.mxu0 %v879_v35 }
 0x57f   :  { %2934 = vmatmul.mubr.f32.gmra.mxu0 %v880_v37 }
 0x580   :  { %2977 = vmatpush3.xpose.msk.msra.mxu0 %vm68_vm0, %v3521_v50  ;;  %2982 = vmatprep.mubr.msk.f32.mxu0 %vm68_vm0, %v1105_v38  ;;  %v1108_v50 = vld [vmem:[#allocation2 + $0x18] sm:$0xff] }
 0x581   :  { %2978 = vmatprep.subr.msk.mxu0 %vm68_vm0, %v3527_v52 }
 0x584   :  { %2979 = vmatpush3.xpose.msk.msra.mxu0 %vm68_vm0, %v3527_v52  ;;  %v1111_v52 = vld [vmem:[#allocation2 + $0x30] sm:$0xff] }
 0x585   :  { %2980 = vmatprep.subr.msk.mxu0 %vm68_vm0, %v3531_v53 }
 0x588   :  { %2981 = vmatpush3.xpose.msk.msra.mxu0 %vm68_vm0, %v3531_v53  ;;  %v2970_v53 = vpop.f32.mrf.mxu1 }
 0x58a   :  { %v1073_v42 = vpop.f32.mrf.mxu1 }
 0x58b   :  { %2983 = vmatmul.mubr.msk.f32.vlgmr.msra.gmra.mxu0 %vm68_vm0, %v1106_v45 }
 0x58c   :  { %2985 = vmatprep.mubr.msk.f32.mxu0 %vm68_vm0, %v1107_v32  ;;  %v2973_v47 = vpop.f32.mrf.mxu1 }
 0x58e   :  { %v1083_v57 = vpop.f32.mrf.mxu1 }
 0x58f   :  { %2986 = vmatmul.mubr.msk.f32.gmra.mxu0 %vm68_vm0, %v1108_v50 }
 0x590   :  { %2988 = vmatprep.mubr.msk.f32.mxu0 %vm68_vm0, %v1109_v36 }
 0x593   :  { %2989 = vmatmul.mubr.msk.f32.gmra.mxu0 %vm68_vm0, %v1110_v29 }
 0x594   :  { %2991 = vmatprep.mubr.msk.f32.mxu0 %vm68_vm0, %v1111_v52 }
 0x597   :  { %2992 = vmatmul.mubr.msk.f32.gmra.mxu0 %vm68_vm0, %v1112_v39 }
 0x63b   :  { %v2932_v40 = vpop.f32.mrf.mxu0 }
 0x63c   :  { %v974_v44 = vadd.f32 %v2932_v40, %v2512_v41 }
 0x63d   :  { %v968_v43 = vpop.f32.mrf.mxu0 }
 0x63e   :  { %v969_v48 = vadd.f32 %v2512_v41, %v968_v43  ;;  %v988_v54 = vmul.f32 %v974_v44, %v3576_v28 }
 0x63f   :  { %v2935_v46 = vpop.f32.mrf.mxu0 }
 0x640   :  { %v984_v49 = vadd.f32 %v2935_v46, %v2512_v41  ;;  %v987_v59 = vmul.f32 %v969_v48, %v3573_v24  ;;  %v1093_v20 = vadd.f32 %v2970_v53, %v988_v54 }
 0x641   :  { %v978_v51 = vpop.f32.mrf.mxu0 }
 0x642   :  { %v979_v55 = vadd.f32 %v2512_v41, %v978_v51  ;;  %v990_v56 = vmul.f32 %v984_v49, %v3599_v12  ;;  %v1092_v13 = vadd.f32 %v1073_v42, %v987_v59  ;;  %v1102_v0 = vadd.f32 %v2513_v62, %v1093_v20 }
 0x644   :  { %v1095_v60 = vadd.f32 %v2973_v47, %v990_v56  ;;  %v989_v61 = vmul.f32 %v979_v55, %v3593_v18  ;;  %v1101_v12 = vadd.f32 %v2513_v62, %v1092_v13 }
 0x646   :  { %v1104_v63 = vadd.f32 %v2513_v62, %v1095_v60  ;;  %v1094_v14 = vadd.f32 %v1083_v57, %v989_v61 }
 0x648   :  { %v1103_v34 = vadd.f32 %v2513_v62, %v1094_v14  ;;  %2994 = vmatprep.subr.mxu1 %v1104_v63 }
 0x649   :  { %2995 = vmatpush3.msra.mxu1 %v1104_v63 }
 0x64a   :  { %2996 = vmatprep.subr.mxu1 %v1103_v34 }
 0x64b   :  { %v3721_v28 = vpop.f32.mrf.mxu0  ;;  %2997 = vmatpush3.msra.mxu1 %v1103_v34 }
 0x64c   :  { %v1245_v24 = vsel %vm643_vm14, %v3721_v28, inf  ;;  %2998 = vmatprep.subr.mxu1 %v1102_v0  ;;  %vm1427_vm13 = vcmp.le.f32.partialorder %v3721_v28, 0.25 }
 0x64d   :  { %1246 = vmin.xlane.f32.xlu0 %v1245_v24  ;;  %v3725_v18 = vpop.f32.mrf.mxu0  ;;  %2999 = vmatpush3.msra.mxu1 %v1102_v0  ;;  %v3827_v63 = vsel %vm1427_vm13, 1.0, %v3415_v17 }
 0x64e   :  { %v1242_v19 = vsel %vm643_vm14, %v3725_v18, inf  ;;  %3000 = vmatprep.subr.mxu1 %v1101_v12  ;;  %vm1426_vm15 = vcmp.le.f32.partialorder %v3725_v18, 0.25  ;;  %v1453_v13 = vsel %vm643_vm14, %v3827_v63, 0.0 }
 0x64f   :  { %1243 = vmin.xlane.f32.xlu1 %v1242_v19  ;;  %v3729_v1 = vpop.f32.mrf.mxu0  ;;  %3001 = vmatpush3.msra.mxu1 %v1101_v12  ;;  %v3832_v14 = vsel %vm1426_vm15, 1.0, %v3415_v17 }
 0x650   :  { %v1251_v11 = vsel %vm643_vm14, %v3729_v1, inf  ;;  %vm1429_vm2 = vcmp.le.f32.partialorder %v3729_v1, 0.25  ;;  %v1450_v0 = vsel %vm643_vm14, %v3832_v14, 0.0 }
 0x651   :  { %1252 = vmin.xlane.f32.xlu0 %v1251_v11  ;;  %v3733_v2 = vpop.f32.mrf.mxu0  ;;  %v3838_v34 = vsel %vm1429_vm2, 1.0, %v3415_v17 }
 0x652   :  { %v1248_v3 = vsel %vm643_vm14, %v3733_v2, inf  ;;  %vm1428_vm3 = vcmp.le.f32.partialorder %v3733_v2, 0.25  ;;  %v1459_v12 = vsel %vm643_vm14, %v3838_v34, 0.0 }
 0x653   :  { %1249 = vmin.xlane.f32.xlu1 %v1248_v3  ;;  %v3737_v4 = vpop.f32.mrf.mxu0 }
 0x654   :  { %v1257_v5 = vsel %vm643_vm14, %v3737_v4, inf  ;;  %vm1431_vm4 = vcmp.le.f32.partialorder %v3737_v4, 0.25 }
 0x655   :  { %1258 = vmin.xlane.f32.xlu0 %v1257_v5  ;;  %v3741_v9 = vpop.f32.mrf.mxu0  ;;  %v3850_v24 = vsel %vm1431_vm4, 1.0, %v3415_v17 }
 0x656   :  { %v1254_v10 = vsel %vm643_vm14, %v3741_v9, inf  ;;  %vm1430_vm1 = vcmp.le.f32.partialorder %v3741_v9, 0.25 }
 0x657   :  { %1255 = vmin.xlane.f32.xlu1 %v1254_v10  ;;  %v3745_v6 = vpop.f32.mrf.mxu0  ;;  %v3856_v19 = vsel %vm1430_vm1, 1.0, %v3415_v17 }
 0x658   :  { %v1263_v58 = vsel %vm643_vm14, %v3745_v6, inf }
 0x659   :  { %1264 = vmin.xlane.f32.xlu0 %v1263_v58  ;;  %v3749_v7 = vpop.f32.mrf.mxu0 }
 0x65a   :  { %v1260_v16 = vsel %vm643_vm14, %v3749_v7, inf  ;;  %vm1432_vm5 = vcmp.le.f32.partialorder %v3749_v7, 0.25 }
 0x65b   :  { %1261 = vmin.xlane.f32.xlu1 %v1260_v16  ;;  %v3861_v11 = vsel %vm1432_vm5, 1.0, %v3415_v17 }
 0x65c   :  { %v1468_v3 = vsel %vm643_vm14, %v3861_v11, 0.0 }
 0x6d6   :  { %v1247_v21 = vpop.xlane.xlu0 %1246 }
 0x6d7   :  { %vm1267_vm0 = vcmp.le.f32.partialorder %v3721_v28, %v1247_v21  ;;  %v3844_v28 = vsel %vm1428_vm3, 1.0, %v3415_v17 }
 0x6d8   :  { %v1275_v25 = vsel %vm1267_vm0, %v3501_v27, 32  ;;  %v1244_v26 = vpop.xlane.xlu1 %1243  ;;  %vm1433_vm0 = vcmp.le.f32.partialorder %v3745_v6, 0.25 }
 0x6d9   :  { %v3756_v22 = vsel %vm643_vm14, %v1275_v25, 2147483647  ;;  %vm1266_vm6 = vcmp.le.f32.partialorder %v3725_v18, %v1244_v26  ;;  %v1456_v18 = vsel %vm643_vm14, %v3844_v28, 0.0 }
 0x6da   :  { %v1274_v15 = vsel %vm1266_vm6, %v3501_v27, 32  ;;  %v1253_v30 = vpop.xlane.xlu0 %1252  ;;  %v1299_v8 = vshra.s32 %v3756_v22, 16 }
 0x6db   :  { %v3762_v31 = vsel %vm643_vm14, %v1274_v15, 2147483647  ;;  %vm1269_vm7 = vcmp.le.f32.partialorder %v3729_v1, %v1253_v30  ;;  %v1465_v1 = vsel %vm643_vm14, %v3850_v24, 0.0 }
 0x6dc   :  { %v1277_v33 = vsel %vm1269_vm7, %v3501_v27, 32  ;;  %v1250_v23 = vpop.xlane.xlu1 %1249  ;;  %v3766_v35 = vcvt.s32.f32 %v1299_v8  ;;  %v1284_v37 = vshra.s32 %v3762_v31, 16 }
 0x6dd   :  { %v3770_v38 = vsel %vm643_vm14, %v1277_v33, 2147483647  ;;  %vm1268_vm8 = vcmp.le.f32.partialorder %v3733_v2, %v1250_v23  ;;  %v1462_v2 = vsel %vm643_vm14, %v3856_v19, 0.0 }
 0x6de   :  { %v1276_v45 = vsel %vm1268_vm8, %v3501_v27, 32  ;;  %v1259_v32 = vpop.xlane.xlu0 %1258  ;;  %1302 = vmin.xlane.f32.xlu0 %v3766_v35  ;;  %v3775_v50 = vcvt.s32.f32 %v1284_v37  ;;  %v1329_v36 = vshra.s32 %v3770_v38, 16 }
 0x6df   :  { %v3779_v29 = vsel %vm643_vm14, %v1276_v45, 2147483647  ;;  %vm1271_vm9 = vcmp.le.f32.partialorder %v3737_v4, %v1259_v32  ;;  %v3869_v4 = vsel %vm1433_vm0, 1.0, %v3415_v17 }
 0x6e0   :  { %v1279_v52 = vsel %vm1271_vm9, %v3501_v27, 32  ;;  %v1256_v39 = vpop.xlane.xlu1 %1255  ;;  %1287 = vmin.xlane.f32.xlu1 %v3775_v50  ;;  %v3784_v53 = vcvt.s32.f32 %v1329_v36  ;;  %v1314_v40 = vshra.s32 %v3779_v29, 16  ;;  %v1471_v5 = vsel %vm643_vm14, %v3869_v4, 0.0 }
 0x6e1   :  { %v3788_v41 = vsel %vm643_vm14, %v1279_v52, 2147483647  ;;  %vm1270_vm10 = vcmp.le.f32.partialorder %v3741_v9, %v1256_v39  ;;  %v1298_v9 = vand.u32 65535, %v3756_v22  ;;  %v1313_v30 = vand.u32 65535, %v3779_v29 }
 0x6e2   :  { %v1278_v42 = vsel %vm1270_vm10, %v3501_v27, 32  ;;  %1332 = vmin.xlane.f32.xlu0 %v3784_v53  ;;  %v1265_v43 = vpop.xlane.xlu0 %1264  ;;  %v3793_v44 = vcvt.s32.f32 %v1314_v40  ;;  %v1359_v46 = vshra.s32 %v3788_v41, 16  ;;  %v1358_v15 = vand.u32 65535, %v3788_v41 }
 0x6e3   :  { %v3797_v47 = vsel %vm643_vm14, %v1278_v42, 2147483647  ;;  %vm1273_vm11 = vcmp.le.f32.partialorder %v3745_v6, %v1265_v43  ;;  %v1300_v58 = vcvt.s32.f32 %v1298_v9  ;;  %v1283_v6 = vand.u32 65535, %v3762_v31 }
 0x6e4   :  { %v1281_v48 = vsel %vm1273_vm11, %v3501_v27, 32  ;;  %1317 = vmin.xlane.f32.xlu1 %v3793_v44  ;;  %v1262_v49 = vpop.xlane.xlu1 %1261  ;;  %v3802_v51 = vcvt.s32.f32 %v1359_v46  ;;  %v1344_v54 = vshra.s32 %v3797_v47, 16  ;;  %v1315_v37 = vcvt.s32.f32 %v1313_v30  ;;  %v3913_v46 = vld [vmem:[#allocation7 + $0x78] sm:$0xff] }
 0x6e5   :  { %v3806_v55 = vsel %vm643_vm14, %v1281_v48, 2147483647  ;;  %vm1272_vm12 = vcmp.le.f32.partialorder %v3749_v7, %v1262_v49  ;;  %v1328_v7 = vand.u32 65535, %v3770_v38  ;;  %v1285_v22 = vcvt.s32.f32 %v1283_v6  ;;  %3014 = vmatprep.subr.mxu1 %v3913_v46  ;;  %v1791_v48 = vld [vmem:[#allocation7 + $0xf8] sm:$0xff]  ;;  %v1790_v49 = vld [vmem:[#allocation7 + $0xf0] sm:$0xff] }
 0x6e6   :  { %v1280_v56 = vsel %vm1272_vm12, %v3501_v27, 32  ;;  %1362 = vmin.xlane.f32.xlu0 %v3802_v51  ;;  %v3811_v57 = vcvt.s32.f32 %v1344_v54  ;;  %v1389_v59 = vshra.s32 %v3806_v55, 16  ;;  %v1388_v38 = vand.u32 65535, %v3806_v55  ;;  %v1788_v54 = vld [vmem:[#allocation7 + $0xe0] sm:$0xff]  ;;  %v1787_v55 = vld [vmem:[#allocation7 + $0xd8] sm:$0xff] }
 0x6e7   :  { %v3815_v60 = vsel %vm643_vm14, %v1280_v56, 2147483647  ;;  %v1330_v26 = vcvt.s32.f32 %v1328_v7  ;;  %v1343_v45 = vand.u32 65535, %v3797_v47  ;;  %v1792_v47 = vld [vmem:[#allocation7 + $0x100] sm:$0xff]  ;;  %v1786_v56 = vld [vmem:[#allocation7 + $0xd0] sm:$0xff] }
 0x6e8   :  { %1347 = vmin.xlane.f32.xlu1 %v3811_v57  ;;  %v3819_v61 = vcvt.s32.f32 %v1389_v59  ;;  %v1374_v62 = vshra.s32 %v3815_v60, 16  ;;  %v1390_v52 = vcvt.s32.f32 %v1388_v38  ;;  %3058 = vmatprep.subr.mxu0 %v1792_v47  ;;  %v1784_v59 = vld [vmem:[#allocation7 + $0xc0] sm:$0xff] }
 0x6e9   :  { %v1345_v39 = vcvt.s32.f32 %v1343_v45  ;;  %3059 = vmatpush3.msra.mxu0 %v1792_v47 }
 0x6ea   :  { %1392 = vmin.xlane.f32.xlu0 %v3819_v61  ;;  %v3824_v20 = vcvt.s32.f32 %v1374_v62  ;;  %3060 = vmatprep.subr.mxu0 %v1791_v48  ;;  %v1781_v62 = vld [vmem:[#allocation7 + $0xa8] sm:$0xff] }
 0x6eb   :  { %3061 = vmatpush3.msra.mxu0 %v1791_v48 }
 0x6ec   :  { %1377 = vmin.xlane.f32.xlu1 %v3824_v20  ;;  %3062 = vmatprep.subr.mxu0 %v1790_v49 }
 0x6ed   :  { %3063 = vmatpush3.msra.mxu0 %v1790_v49 }
 0x6ee   :  { %1454 = vadd.xlane.f32.xlu0 %v1453_v13 }
 0x6f0   :  { %1451 = vadd.xlane.f32.xlu1 %v1450_v0 }
 0x6f2   :  { %1460 = vadd.xlane.f32.xlu0 %v1459_v12 }
 0x6f4   :  { %1457 = vadd.xlane.f32.xlu1 %v1456_v18 }
 0x6f6   :  { %1466 = vadd.xlane.f32.xlu0 %v1465_v1 }
 0x6f8   :  { %1463 = vadd.xlane.f32.xlu1 %v1462_v2 }
 0x6fa   :  { %1469 = vadd.xlane.f32.xlu0 %v1468_v3 }
 0x6fe   :  { %1472 = vadd.xlane.f32.xlu0 %v1471_v5 }
 0x767   :  { %v3874_v10 = vpop.xlane.xlu0 %1302 }
 0x768   :  { %vm1304_vm6 = vcmp.eq.f32.partialorder %v3766_v35, %v3874_v10  ;;  %v1360_v35 = vcvt.s32.f32 %v1358_v15  ;;  %v1309_v6 = vcvt.f32.s32 %v3874_v10 }
 0x769   :  { %v3880_v16 = vpop.xlane.xlu1 %1287  ;;  %v1305_v21 = vsel %vm1304_vm6, %v1300_v58, inf }
 0x76a   :  { %1306 = vmin.xlane.f32.xlu1 %v1305_v21  ;;  %vm1289_vm7 = vcmp.eq.f32.partialorder %v3775_v50, %v3880_v16  ;;  %v1310_v15 = vshll.u32 %v1309_v6, 16  ;;  %v1294_v30 = vcvt.f32.s32 %v3880_v16 }
 0x76b   :  { %v3884_v25 = vpop.xlane.xlu0 %1332  ;;  %v1290_v33 = vsel %vm1289_vm7, %v1285_v22, inf }
 0x76c   :  { %vm1334_vm8 = vcmp.eq.f32.partialorder %v3784_v53, %v3884_v25  ;;  %v1373_v53 = vand.u32 65535, %v3815_v60  ;;  %v1783_v60 = vld [vmem:[#allocation7 + $0xb8] sm:$0xff] }
 0x76d   :  { %v3890_v8 = vpop.xlane.xlu1 %1317  ;;  %v1335_v31 = vsel %vm1334_vm8, %v1330_v26, inf }
 0x76e   :  { %1336 = vmin.xlane.f32.xlu0 %v1335_v31  ;;  %1291 = vmin.xlane.f32.xlu1 %v1290_v33  ;;  %vm1319_vm9 = vcmp.eq.f32.partialorder %v3793_v44, %v3890_v8  ;;  %v1375_v43 = vcvt.s32.f32 %v1373_v53  ;;  %v1339_v33 = vcvt.f32.s32 %v3884_v25  ;;  %v1324_v10 = vcvt.f32.s32 %v3890_v8 }
 0x76f   :  { %v3894_v23 = vpop.xlane.xlu0 %1362  ;;  %v1320_v36 = vsel %vm1319_vm9, %v1315_v37, inf }
 0x770   :  { %vm1364_vm10 = vcmp.eq.f32.partialorder %v3802_v51, %v3894_v23  ;;  %v1789_v51 = vld [vmem:[#allocation7 + $0xe8] sm:$0xff]  ;;  %v1325_v48 = vshll.u32 %v1324_v10, 16 }
 0x771   :  { %v3900_v32 = vpop.xlane.xlu1 %1347  ;;  %v1365_v50 = vsel %vm1364_vm10, %v1360_v35, inf  ;;  %3064 = vmatprep.subr.mxu0 %v1789_v51 }
 0x772   :  { %1366 = vmin.xlane.f32.xlu0 %v1365_v50  ;;  %1321 = vmin.xlane.f32.xlu1 %v1320_v36  ;;  %vm1349_vm11 = vcmp.eq.f32.partialorder %v3811_v57, %v3900_v32  ;;  %v1785_v57 = vld [vmem:[#allocation7 + $0xc8] sm:$0xff]  ;;  %v1295_v50 = vshll.u32 %v1294_v30, 16  ;;  %v1369_v36 = vcvt.f32.s32 %v3894_v23 }
 0x773   :  { %v3904_v29 = vpop.xlane.xlu0 %1392  ;;  %v1350_v42 = vsel %vm1349_vm11, %v1345_v39, inf  ;;  %3065 = vmatpush3.msra.mxu0 %v1789_v51 }
 0x774   :  { %vm1394_vm12 = vcmp.eq.f32.partialorder %v3819_v61, %v3904_v29  ;;  %3066 = vmatprep.subr.mxu0 %v1788_v54  ;;  %v1782_v61 = vld [vmem:[#allocation7 + $0xb0] sm:$0xff]  ;;  %v1370_v49 = vshll.u32 %v1369_v36, 16  ;;  %v1399_v8 = vcvt.f32.s32 %v3904_v29  ;;  %v1654_v36 = vld [vmem:[#allocation7 + $0x58] sm:$0xff] }
 0x775   :  { %v3909_v40 = vpop.xlane.xlu1 %1377  ;;  %v1395_v41 = vsel %vm1394_vm12, %v1390_v52, inf  ;;  %3067 = vmatpush3.msra.mxu0 %v1788_v54 }
 0x776   :  { %1396 = vmin.xlane.f32.xlu0 %v1395_v41  ;;  %1351 = vmin.xlane.f32.xlu1 %v1350_v42  ;;  %vm1379_vm13 = vcmp.eq.f32.partialorder %v3824_v20, %v3909_v40  ;;  %v1780_v20 = vld [vmem:[#allocation7 + $0xa0] sm:$0xff]  ;;  %v1340_v41 = vshll.u32 %v1339_v33, 16 }
 0x777   :  { %v1380_v44 = vsel %vm1379_vm13, %v1375_v43, inf  ;;  %3068 = vmatprep.subr.mxu0 %v1787_v55  ;;  %v1455_v13 = vpop.xlane.xlu0 %1454  ;;  %v1354_v43 = vcvt.f32.s32 %v3900_v32 }
 0x778   :  { %3069 = vmatpush3.msra.mxu0 %v1787_v55  ;;  %v1475_v3 = vmax.f32 %v1455_v13, 1.0  ;;  %v1400_v13 = vshll.u32 %v1399_v8, 16  ;;  %v1644_v8 = vld [vmem:[#allocation7 + $0x8] sm:$0xff] }
 0x779   :  { %3070 = vmatprep.subr.mxu0 %v1786_v56  ;;  %v1452_v12 = vpop.xlane.xlu1 %1451 }
 0x77a   :  { %1381 = vmin.xlane.f32.xlu1 %v1380_v44  ;;  %3071 = vmatpush3.msra.mxu0 %v1786_v56  ;;  %v1474_v1 = vmax.f32 %v1452_v12, 1.0 }
 0x77b   :  { %3072 = vmatprep.subr.mxu0 %v1785_v57  ;;  %v1461_v0 = vpop.xlane.xlu0 %1460 }
 0x77c   :  { %3073 = vmatpush3.msra.mxu0 %v1785_v57  ;;  %3306 = vrcp.f32 %v1474_v1  ;;  %v1477_v58 = vmax.f32 %v1461_v0, 1.0  ;;  %v1384_v0 = vcvt.f32.s32 %v3909_v40 }
 0x77d   :  { %3074 = vmatprep.subr.mxu0 %v1784_v59  ;;  %v1458_v2 = vpop.xlane.xlu1 %1457  ;;  %3308 = vrcp.f32 %v1475_v3 }
 0x77e   :  { %3075 = vmatpush3.msra.mxu0 %v1784_v59  ;;  %v1476_v5 = vmax.f32 %v1458_v2, 1.0 }
 0x77f   :  { %3076 = vmatprep.subr.mxu0 %v1783_v60  ;;  %v1467_v18 = vpop.xlane.xlu0 %1466 }
 0x780   :  { %3077 = vmatpush3.msra.mxu0 %v1783_v60  ;;  %3310 = vrcp.f32 %v1476_v5  ;;  %v1479_v26 = vmax.f32 %v1467_v18, 1.0 }
 0x781   :  { %3078 = vmatprep.subr.mxu0 %v1782_v61  ;;  %v1464_v7 = vpop.xlane.xlu1 %1463  ;;  %3312 = vrcp.f32 %v1477_v58 }
 0x782   :  { %3079 = vmatpush3.msra.mxu0 %v1782_v61  ;;  %v1478_v21 = vmax.f32 %v1464_v7, 1.0 }
 0x783   :  { %3080 = vmatprep.subr.mxu0 %v1781_v62  ;;  %v1470_v9 = vpop.xlane.xlu0 %1469 }
 0x784   :  { %3081 = vmatpush3.msra.mxu0 %v1781_v62  ;;  %3314 = vrcp.f32 %v1478_v21  ;;  %v1480_v35 = vmax.f32 %v1470_v9, 1.0  ;;  %v1355_v62 = vshll.u32 %v1354_v43, 16  ;;  %v1657_v9 = vld [vmem:[#allocation7 + $0x70] sm:$0xff] }
 0x785   :  { %3082 = vmatprep.subr.mxu0 %v1780_v20  ;;  %3316 = vrcp.f32 %v1479_v26 }
 0x786   :  { %3083 = vmatpush3.msra.mxu0 %v1780_v20  ;;  %3318 = vrcp.f32 %v1480_v35 }
 0x787   :  { %v1473_v22 = vpop.xlane.xlu0 %1472 }
 0x788   :  { %v1481_v38 = vmax.f32 %v1473_v22, 1.0  ;;  %v1656_v22 = vld [vmem:[#allocation7 + $0x68] sm:$0xff] }
 0x789   :  { %v3307_v53 = vpop.eup %3306 }
 0x78a   :  { %3320 = vrcp.f32 %v1481_v38  ;;  %v3309_v25 = vpop.eup %3308  ;;  %v1490_v23 = vmul.f32 %v3307_v53, %v3832_v14 }
 0x78b   :  { %v1491_v60 = vmul.f32 %v3309_v25, %v3827_v63  ;;  %v1652_v25 = vld [vmem:[#allocation7 + $0x48] sm:$0xff] }
 0x78d   :  { %v3311_v55 = vpop.eup %3310 }
 0x78e   :  { %v3313_v61 = vpop.eup %3312  ;;  %v1492_v18 = vmul.f32 %v3311_v55, %v3844_v28  ;;  %v1769_v55 = vld [vmem:[#allocation5] sm:$0xff] }
 0x78f   :  { %v1493_v7 = vmul.f32 %v3313_v61, %v3838_v34  ;;  %3090 = vmatprep.mubr.f32.mxu0 %v1769_v55  ;;  %v1775_v61 = vld [vmem:[#allocation5 + $0x30] sm:$0xff]  ;;  %v2551_v55 = vld [vmem:[#allocation7 + $0x108] ss:$0 sm:$0xff] }
 0x791   :  { %v3315_v58 = vpop.eup %3314 }
 0x792   :  { %v3317_v28 = vpop.eup %3316  ;;  %v1494_v34 = vmul.f32 %v3315_v58, %v3856_v19 }
 0x793   :  { %v3319_v38 = vpop.eup %3318 }
 0x794   :  { %v1496_v53 = vmul.f32 %v3319_v38, %v3861_v11  ;;  %v1650_v11 = vld [vmem:[#allocation7 + $0x38] sm:$0xff]  ;;  %v1922_v38 = vld [vmem:[#allocation7 + $0x348] sm:$0xff] }
 0x7f3   :  { %v1307_v31 = vpop.xlane.xlu1 %1306 }
 0x7f4   :  { %v1308_v37 = vcvt.f32.s32 %v1307_v31 }
 0x7f6   :  { %v1311_v45 = vadd.s32 %v1310_v15, %v1308_v37  ;;  %v1385_v15 = vshll.u32 %v1384_v0, 16  ;;  %v1655_v37 = vld [vmem:[#allocation7 + $0x60] sm:$0xff] }
 0x7f7   :  { %v1337_v52 = vpop.xlane.xlu0 %1336  ;;  %v1292_v39 = vpop.xlane.xlu1 %1291 }
 0x7f8   :  { %v1338_v16 = vcvt.f32.s32 %v1337_v52  ;;  %v1293_v42 = vcvt.f32.s32 %v1292_v39  ;;  %vm1403_vm15 = vcmp.eq.s32.totalorder %v3501_v27, %v1311_v45  ;;  %v1495_v45 = vmul.f32 %v3317_v28, %v3850_v24  ;;  %v1653_v24 = vld [vmem:[#allocation7 + $0x50] sm:$0xff] }
 0x7f9   :  { %v2527_v56 = vsel %vm1403_vm15, 1.0, %v3415_v17 }
 0x7fa   :  { %v1341_v44 = vadd.s32 %v1340_v41, %v1338_v16  ;;  %v1296_v47 = vadd.s32 %v1295_v50, %v1293_v42  ;;  %v1499_v12 = vadd.f32 %v2527_v56, %v1491_v60  ;;  %v3321_v50 = vpop.eup %3320  ;;  %v1770_v56 = vld [vmem:[#allocation5 + $0x8] sm:$0xff]  ;;  %v1773_v60 = vld [vmem:[#allocation5 + $0x20] sm:$0xff] }
 0x7fb   :  { %v1367_v51 = vpop.xlane.xlu0 %1366  ;;  %v1322_v54 = vpop.xlane.xlu1 %1321  ;;  %v1497_v41 = vmul.f32 %v3321_v50, %v3869_v4  ;;  %v1648_v4 = vld [vmem:[#allocation7 + $0x28] sm:$0xff]  ;;  %v1919_v50 = vld [vmem:[#allocation7 + $0x330] sm:$0xff] }
 0x7fc   :  { %vm1402_vm2 = vcmp.eq.s32.totalorder %v3501_v27, %v1296_v47  ;;  %v1368_v57 = vcvt.f32.s32 %v1367_v51  ;;  %v1323_v59 = vcvt.f32.s32 %v1322_v54  ;;  %vm1405_vm3 = vcmp.eq.s32.totalorder %v3501_v27, %v1341_v44  ;;  %v1647_v44 = vld [vmem:[#allocation7 + $0x20] sm:$0xff]  ;;  %v1646_v47 = vld [vmem:[#allocation7 + $0x18] sm:$0xff]  ;;  %v1777_v54 = vld [vmem:[#allocation7 + $0x88] sm:$0xff] }
 0x7fd   :  { %v2526_v32 = vsel %vm1402_vm2, 1.0, %v3415_v17  ;;  %v2529_v3 = vsel %vm1405_vm3, 1.0, %v3415_v17  ;;  %v1643_v51 = vld [vmem:[#allocation7] sm:$0xff] }
 0x7fe   :  { %v1498_v29 = vadd.f32 %v2526_v32, %v1490_v23  ;;  %v1371_v20 = vadd.s32 %v1370_v49, %v1368_v57  ;;  %v1326_v14 = vadd.s32 %v1325_v48, %v1323_v59  ;;  %v1501_v30 = vadd.f32 %v2529_v3, %v1493_v7  ;;  %v1645_v48 = vld [vmem:[#allocation7 + $0x10] sm:$0xff]  ;;  %v1779_v49 = vld [vmem:[#allocation7 + $0x98] sm:$0xff]  ;;  %v1771_v57 = vld [vmem:[#allocation5 + $0x10] sm:$0xff] }
 0x7ff   :  { %v1397_v1 = vpop.xlane.xlu0 %1396  ;;  %v1352_v2 = vpop.xlane.xlu1 %1351  ;;  %3084 = vmatprep.subr.mxu0 %v1779_v49  ;;  %v1778_v23 = vld [vmem:[#allocation7 + $0x90] sm:$0xff]  ;;  %v1772_v59 = vld [vmem:[#allocation5 + $0x18] sm:$0xff]  ;;  %v1774_v32 = vld [vmem:[#allocation5 + $0x28] sm:$0xff] }
 0x800   :  { %vm1404_vm4 = vcmp.eq.s32.totalorder %v3501_v27, %v1326_v14  ;;  %v1398_v63 = vcvt.f32.s32 %v1397_v1  ;;  %v1353_v5 = vcvt.f32.s32 %v1352_v2  ;;  %3002 = vmatprep.mubr.msk.f32.mxu1 %vm643_vm14, %v1498_v29  ;;  %vm1407_vm1 = vcmp.eq.s32.totalorder %v3501_v27, %v1371_v20  ;;  %3085 = vmatpush3.msra.mxu0 %v1779_v49  ;;  %v1934_v29 = vld [vmem:[#allocation7 + $0x3a8] sm:$0xff]  ;;  %v1932_v3 = vld [vmem:[#allocation7 + $0x398] sm:$0xff] }
 0x801   :  { %v2528_v40 = vsel %vm1404_vm4, 1.0, %v3415_v17  ;;  %3003 = vmatmul.mubr.msk.f32.vlgmr.msra.gmra.mxu1 %vm643_vm14, %v1499_v12  ;;  %v2531_v33 = vsel %vm1407_vm1, 1.0, %v3415_v17  ;;  %3086 = vmatprep.subr.mxu0 %v1778_v23 }
 0x802   :  { %v1500_v6 = vadd.f32 %v2528_v40, %v1492_v18  ;;  %v1401_v21 = vadd.s32 %v1400_v13, %v1398_v63  ;;  %v1356_v26 = vadd.s32 %v1355_v62, %v1353_v5  ;;  %3015 = vmatpush3.msra.mxu1 %v3913_v46  ;;  %v1503_v52 = vadd.f32 %v2531_v33, %v1495_v45  ;;  %v1776_v62 = vld [vmem:[#allocation5 + $0x38] sm:$0xff]  ;;  %v1933_v18 = vld [vmem:[#allocation7 + $0x3a0] sm:$0xff] }
 0x803   :  { %v1382_v31 = vpop.xlane.xlu1 %1381  ;;  %3016 = vmatprep.subr.mxu1 %v1657_v9  ;;  %3087 = vmatpush3.msra.mxu0 %v1778_v23  ;;  %v1930_v40 = vld [vmem:[#allocation7 + $0x388] sm:$0xff]  ;;  %v1921_v45 = vld [vmem:[#allocation7 + $0x340] sm:$0xff] }
 0x804   :  { %vm1406_vm5 = vcmp.eq.s32.totalorder %v3501_v27, %v1356_v26  ;;  %v1383_v35 = vcvt.f32.s32 %v1382_v31  ;;  %3005 = vmatprep.mubr.msk.f32.mxu1 %vm643_vm14, %v1500_v6  ;;  %3017 = vmatpush3.msra.mxu1 %v1657_v9  ;;  %vm1409_vm0 = vcmp.eq.s32.totalorder %v3501_v27, %v1401_v21  ;;  %v1931_v9 = vld [vmem:[#allocation7 + $0x390] sm:$0xff]  ;;  %v1929_v21 = vld [vmem:[#allocation7 + $0x380] sm:$0xff]  ;;  %v1926_v33 = vld [vmem:[#allocation7 + $0x368] sm:$0xff] }
 0x805   :  { %v2530_v46 = vsel %vm1406_vm5, 1.0, %v3415_v17  ;;  %3006 = vmatmul.mubr.msk.f32.gmra.mxu1 %vm643_vm14, %v1501_v30  ;;  %3018 = vmatprep.subr.mxu1 %v1656_v22  ;;  %v2533_v39 = vsel %vm1409_vm0, 1.0, %v3415_v17  ;;  %v1927_v31 = vld [vmem:[#allocation7 + $0x370] sm:$0xff] }
 0x806   :  { %v1502_v10 = vadd.f32 %v2530_v46, %v1494_v34  ;;  %v1386_v19 = vadd.s32 %v1385_v15, %v1383_v35  ;;  %3019 = vmatpush3.msra.mxu1 %v1656_v22  ;;  %v1505_v43 = vadd.f32 %v2533_v39, %v1497_v41  ;;  %3088 = vmatprep.subr.mxu0 %v1777_v54  ;;  %v1928_v15 = vld [vmem:[#allocation7 + $0x378] sm:$0xff]  ;;  %v1925_v34 = vld [vmem:[#allocation7 + $0x360] sm:$0xff]  ;;  %v2064_v39 = vld [vmem:[#allocation7 + $0x410] sm:$0xff] }
 0x807   :  { %3020 = vmatprep.subr.mxu1 %v1655_v37  ;;  %3089 = vmatpush3.msra.mxu0 %v1777_v54  ;;  %v1924_v35 = vld [vmem:[#allocation7 + $0x358] sm:$0xff] }
 0x808   :  { %vm1408_vm6 = vcmp.eq.s32.totalorder %v3501_v27, %v1386_v19  ;;  %3008 = vmatprep.mubr.msk.f32.mxu1 %vm643_vm14, %v1502_v10  ;;  %3021 = vmatpush3.msra.mxu1 %v1655_v37  ;;  %v1651_v27 = vld [vmem:[#allocation7 + $0x40] sm:$0xff]  ;;  %v1923_v37 = vld [vmem:[#allocation7 + $0x350] sm:$0xff]  ;;  %v1920_v46 = vld [vmem:[#allocation7 + $0x338] sm:$0xff] }
 0x809   :  { %v2532_v16 = vsel %vm1408_vm6, 1.0, %v3415_v17  ;;  %3009 = vmatmul.mubr.msk.f32.gmra.mxu1 %vm643_vm14, %v1503_v52  ;;  %3022 = vmatprep.subr.mxu1 %v1654_v36  ;;  %v1649_v17 = vld [vmem:[#allocation7 + $0x30] sm:$0xff]  ;;  %v2067_v19 = vld [vmem:[#allocation7 + $0x428] sm:$0xff]  ;;  %v2065_v52 = vld [vmem:[#allocation7 + $0x418] sm:$0xff] }
 0x80a   :  { %v1504_v42 = vadd.f32 %v2532_v16, %v1496_v53  ;;  %3023 = vmatpush3.msra.mxu1 %v1654_v36  ;;  %3091 = vmatmul.mubr.f32.vlgmr.msra.gmra.mxu0 %v1770_v56  ;;  %v2068_v10 = vld [vmem:[#allocation7 + $0x430] sm:$0xff]  ;;  %v2066_v36 = vld [vmem:[#allocation7 + $0x420] sm:$0xff]  ;;  %v2063_v53 = vld [vmem:[#allocation7 + $0x408] sm:$0xff] }
 0x80b   :  { %3024 = vmatprep.subr.mxu1 %v1653_v24  ;;  %3093 = vmatprep.mubr.f32.mxu0 %v1771_v57  ;;  %v2061_v41 = vld [vmem:[#allocation7 + $0x3f8] sm:$0xff]  ;;  %v2060_v16 = vld [vmem:[#allocation7 + $0x3f0] sm:$0xff] }
 0x80c   :  { %3011 = vmatprep.mubr.msk.f32.mxu1 %vm643_vm14, %v1504_v42  ;;  %3025 = vmatpush3.msra.mxu1 %v1653_v24  ;;  %v2062_v24 = vld [vmem:[#allocation7 + $0x400] sm:$0xff]  ;;  %v2059_v42 = vld [vmem:[#allocation7 + $0x3e8] sm:$0xff] }
 0x80d   :  { %3012 = vmatmul.mubr.msk.f32.gmra.mxu1 %vm643_vm14, %v1505_v43  ;;  %3026 = vmatprep.subr.mxu1 %v1652_v25  ;;  %v2057_v43 = vld [vmem:[#allocation7 + $0x3d8] sm:$0xff] }
 0x80e   :  { %3027 = vmatpush3.msra.mxu1 %v1652_v25  ;;  %3094 = vmatmul.mubr.f32.gmra.mxu0 %v1772_v59  ;;  %v2058_v25 = vld [vmem:[#allocation7 + $0x3e0] sm:$0xff] }
 0x80f   :  { %3028 = vmatprep.subr.mxu1 %v1651_v27  ;;  %3096 = vmatprep.mubr.f32.mxu0 %v1773_v60 }
 0x810   :  { %3029 = vmatpush3.msra.mxu1 %v1651_v27  ;;  %3146 = vmatprep.subr.mxu0 %v2068_v10 }
 0x811   :  { %3030 = vmatprep.subr.mxu1 %v1650_v11  ;;  %3147 = vmatpush3.msra.mxu0 %v2068_v10  ;;  %v2196_v10 = vld [vmem:[#allocation7 + $0x488] sm:$0xff] }
 0x812   :  { %3031 = vmatpush3.msra.mxu1 %v1650_v11  ;;  %3097 = vmatmul.mubr.f32.gmra.mxu0 %v1774_v32 }
 0x813   :  { %3032 = vmatprep.subr.mxu1 %v1649_v17  ;;  %3099 = vmatprep.mubr.f32.mxu0 %v1775_v61 }
 0x814   :  { %3033 = vmatpush3.msra.mxu1 %v1649_v17  ;;  %3148 = vmatprep.subr.mxu0 %v2067_v19 }
 0x815   :  { %3034 = vmatprep.subr.mxu1 %v1648_v4  ;;  %3149 = vmatpush3.msra.mxu0 %v2067_v19  ;;  %v2195_v19 = vld [vmem:[#allocation7 + $0x480] sm:$0xff] }
 0x816   :  { %3035 = vmatpush3.msra.mxu1 %v1648_v4  ;;  %3100 = vmatmul.mubr.f32.gmra.mxu0 %v1776_v62  ;;  %v2550_v4 = vld [vmem:[#allocation7 + $0x80] ss:$0 sm:$0xff] }
 0x817   :  { %3036 = vmatprep.subr.mxu1 %v1647_v44  ;;  %3150 = vmatprep.subr.mxu0 %v2066_v36 }
 0x818   :  { %3037 = vmatpush3.msra.mxu1 %v1647_v44  ;;  %3151 = vmatpush3.msra.mxu0 %v2066_v36  ;;  %v2194_v36 = vld [vmem:[#allocation7 + $0x478] sm:$0xff] }
 0x819   :  { %3038 = vmatprep.subr.mxu1 %v1646_v47  ;;  %3152 = vmatprep.subr.mxu0 %v2065_v52 }
 0x81a   :  { %3039 = vmatpush3.msra.mxu1 %v1646_v47  ;;  %3153 = vmatpush3.msra.mxu0 %v2065_v52  ;;  %v2193_v52 = vld [vmem:[#allocation7 + $0x470] sm:$0xff] }
 0x81b   :  { %3040 = vmatprep.subr.mxu1 %v1645_v48  ;;  %3154 = vmatprep.subr.mxu0 %v2064_v39 }
 0x81c   :  { %3041 = vmatpush3.msra.mxu1 %v1645_v48  ;;  %3155 = vmatpush3.msra.mxu0 %v2064_v39  ;;  %v2192_v39 = vld [vmem:[#allocation7 + $0x468] sm:$0xff] }
 0x81d   :  { %3042 = vmatprep.subr.mxu1 %v1644_v8  ;;  %3156 = vmatprep.subr.mxu0 %v2063_v53 }
 0x81e   :  { %3043 = vmatpush3.msra.mxu1 %v1644_v8  ;;  %3157 = vmatpush3.msra.mxu0 %v2063_v53  ;;  %v2191_v53 = vld [vmem:[#allocation7 + $0x460] sm:$0xff] }
 0x81f   :  { %3044 = vmatprep.subr.mxu1 %v1643_v51  ;;  %3158 = vmatprep.subr.mxu0 %v2062_v24 }
 0x820   :  { %3045 = vmatpush3.msra.mxu1 %v1643_v51  ;;  %3159 = vmatpush3.msra.mxu0 %v2062_v24  ;;  %v2552_v24 = vld [vmem:[#allocation7 + $0x3b0] ss:$0 sm:$0xff] }
 0x821   :  { %3102 = vmatprep.subr.mxu1 %v1934_v29  ;;  %3160 = vmatprep.subr.mxu0 %v2061_v41 }
 0x822   :  { %3161 = vmatpush3.msra.mxu0 %v2061_v41 }
 0x823   :  { %3162 = vmatprep.subr.mxu0 %v2060_v16 }
 0x824   :  { %3163 = vmatpush3.msra.mxu0 %v2060_v16 }
 0x825   :  { %3164 = vmatprep.subr.mxu0 %v2059_v42 }
 0x826   :  { %3165 = vmatpush3.msra.mxu0 %v2059_v42 }
 0x827   :  { %3166 = vmatprep.subr.mxu0 %v2058_v25 }
 0x828   :  { %3167 = vmatpush3.msra.mxu0 %v2058_v25 }
 0x829   :  { %3168 = vmatprep.subr.mxu0 %v2057_v43 }
 0x82a   :  { %3169 = vmatpush3.msra.mxu0 %v2057_v43 }
 0x8c1   :  { %v3004_v20 = vpop.f32.mrf.mxu1 }
 0x8c2   :  { %v1636_v0 = vmax.f32 %v3004_v20, 0.0 }
 0x8c3   :  { %v1596_v14 = vpop.f32.mrf.mxu1 }
 0x8c4   :  { %v1635_v13 = vmax.f32 %v1596_v14, 0.0 }
 0x8c5   :  { %v3007_v12 = vpop.f32.mrf.mxu1 }
 0x8c6   :  { %3046 = vmatprep.mubr.f32.mxu1 %v1635_v13  ;;  %v1638_v63 = vmax.f32 %v3007_v12, 0.0 }
 0x8c7   :  { %v1606_v1 = vpop.f32.mrf.mxu1  ;;  %3047 = vmatmul.mubr.f32.vlgmr.msra.gmra.mxu1 %v1636_v0 }
 0x8c8   :  { %v1637_v2 = vmax.f32 %v1606_v1, 0.0  ;;  %3103 = vmatpush3.msra.mxu1 %v1934_v29 }
 0x8c9   :  { %v3010_v5 = vpop.f32.mrf.mxu1  ;;  %3104 = vmatprep.subr.mxu1 %v1933_v18 }
 0x8ca   :  { %3049 = vmatprep.mubr.f32.mxu1 %v1637_v2  ;;  %3105 = vmatpush3.msra.mxu1 %v1933_v18  ;;  %v1640_v28 = vmax.f32 %v3010_v5, 0.0  ;;  %v3092_v27 = vpop.f32.mrf.mxu0 }
 0x8cb   :  { %v1616_v58 = vpop.f32.mrf.mxu1  ;;  %3050 = vmatmul.mubr.f32.gmra.mxu1 %v1638_v63  ;;  %3106 = vmatprep.subr.mxu1 %v1932_v3 }
 0x8cc   :  { %v1639_v7 = vmax.f32 %v1616_v58, 0.0  ;;  %3107 = vmatpush3.msra.mxu1 %v1932_v3  ;;  %v1859_v11 = vpop.f32.mrf.mxu0 }
 0x8cd   :  { %v3013_v6 = vpop.f32.mrf.mxu1  ;;  %3108 = vmatprep.subr.mxu1 %v1931_v9 }
 0x8ce   :  { %3052 = vmatprep.mubr.f32.mxu1 %v1639_v7  ;;  %3109 = vmatpush3.msra.mxu1 %v1931_v9  ;;  %v1642_v30 = vmax.f32 %v3013_v6, 0.0  ;;  %v3095_v17 = vpop.f32.mrf.mxu0 }
 0x8cf   :  { %v1626_v26 = vpop.f32.mrf.mxu1  ;;  %3053 = vmatmul.mubr.f32.gmra.mxu1 %v1640_v28  ;;  %3110 = vmatprep.subr.mxu1 %v1930_v40 }
 0x8d0   :  { %v1641_v22 = vmax.f32 %v1626_v26, 0.0  ;;  %3111 = vmatpush3.msra.mxu1 %v1930_v40  ;;  %v1869_v47 = vpop.f32.mrf.mxu0 }
 0x8d1   :  { %3112 = vmatprep.subr.mxu1 %v1929_v21 }
 0x8d2   :  { %3055 = vmatprep.mubr.f32.mxu1 %v1641_v22  ;;  %3113 = vmatpush3.msra.mxu1 %v1929_v21  ;;  %v3098_v54 = vpop.f32.mrf.mxu0 }
 0x8d3   :  { %3056 = vmatmul.mubr.f32.gmra.mxu1 %v1642_v30  ;;  %3114 = vmatprep.subr.mxu1 %v1928_v15  ;;  %v2056_v30 = vld [vmem:[#allocation7 + $0x3d0] sm:$0xff] }
 0x8d4   :  { %3115 = vmatpush3.msra.mxu1 %v1928_v15  ;;  %v1879_v20 = vpop.f32.mrf.mxu0  ;;  %3170 = vmatprep.subr.mxu0 %v2056_v30 }
 0x8d5   :  { %3116 = vmatprep.subr.mxu1 %v1927_v31  ;;  %3171 = vmatpush3.msra.mxu0 %v2056_v30 }
 0x8d6   :  { %3117 = vmatpush3.msra.mxu1 %v1927_v31  ;;  %v3101_v63 = vpop.f32.mrf.mxu0  ;;  %v2055_v31 = vld [vmem:[#allocation7 + $0x3c8] sm:$0xff] }
 0x8d7   :  { %3118 = vmatprep.subr.mxu1 %v1926_v33  ;;  %3172 = vmatprep.subr.mxu0 %v2055_v31 }
 0x8d8   :  { %3119 = vmatpush3.msra.mxu1 %v1926_v33  ;;  %v1889_v21 = vpop.f32.mrf.mxu0  ;;  %3173 = vmatpush3.msra.mxu0 %v2055_v31  ;;  %v2054_v33 = vld [vmem:[#allocation7 + $0x3c0] sm:$0xff] }
 0x8d9   :  { %3120 = vmatprep.subr.mxu1 %v1925_v34  ;;  %3174 = vmatprep.subr.mxu0 %v2054_v33 }
 0x8da   :  { %3121 = vmatpush3.msra.mxu1 %v1925_v34  ;;  %3175 = vmatpush3.msra.mxu0 %v2054_v33  ;;  %v2053_v34 = vld [vmem:[#allocation7 + $0x3b8] sm:$0xff] }
 0x8db   :  { %3122 = vmatprep.subr.mxu1 %v1924_v35  ;;  %3176 = vmatprep.subr.mxu0 %v2053_v34 }
 0x8dc   :  { %3123 = vmatpush3.msra.mxu1 %v1924_v35  ;;  %3177 = vmatpush3.msra.mxu0 %v2053_v34  ;;  %v2202_v35 = vld [vmem:[#allocation7 + $0x4b8] sm:$0xff] }
 0x8dd   :  { %3124 = vmatprep.subr.mxu1 %v1923_v37 }
 0x8de   :  { %3125 = vmatpush3.msra.mxu1 %v1923_v37  ;;  %v2201_v37 = vld [vmem:[#allocation7 + $0x4b0] sm:$0xff] }
 0x8df   :  { %3126 = vmatprep.subr.mxu1 %v1922_v38 }
 0x8e0   :  { %3127 = vmatpush3.msra.mxu1 %v1922_v38  ;;  %v2200_v38 = vld [vmem:[#allocation7 + $0x4a8] sm:$0xff] }
 0x8e1   :  { %3128 = vmatprep.subr.mxu1 %v1921_v45 }
 0x8e2   :  { %3129 = vmatpush3.msra.mxu1 %v1921_v45  ;;  %v2199_v45 = vld [vmem:[#allocation7 + $0x4a0] sm:$0xff] }
 0x8e3   :  { %3130 = vmatprep.subr.mxu1 %v1920_v46 }
 0x8e4   :  { %3131 = vmatpush3.msra.mxu1 %v1920_v46  ;;  %v2198_v46 = vld [vmem:[#allocation7 + $0x498] sm:$0xff] }
 0x8e5   :  { %3132 = vmatprep.subr.mxu1 %v1919_v50 }
 0x8e6   :  { %3133 = vmatpush3.msra.mxu1 %v1919_v50  ;;  %v2197_v50 = vld [vmem:[#allocation7 + $0x490] sm:$0xff] }
 0x8e7   :  { %3190 = vmatprep.subr.mxu1 %v2202_v35 }
 0x987   :  { %v3048_v44 = vpop.f32.mrf.mxu1 }
 0x988   :  { %v1736_v48 = vadd.f32 %v3048_v44, %v2550_v4 }
 0x989   :  { %v1730_v49 = vpop.f32.mrf.mxu1 }
 0x98a   :  { %v1731_v8 = vadd.f32 %v2550_v4, %v1730_v49  ;;  %v1899_v23 = vadd.f32 %v3092_v27, %v1736_v48 }
 0x98b   :  { %v3051_v51 = vpop.f32.mrf.mxu1 }
 0x98c   :  { %v1898_v56 = vadd.f32 %v1859_v11, %v1731_v8  ;;  %v1746_v57 = vadd.f32 %v3051_v51, %v2550_v4  ;;  %v1912_v61 = vadd.f32 %v2551_v55, %v1899_v23 }
 0x98d   :  { %v1740_v59 = vpop.f32.mrf.mxu1 }
 0x98e   :  { %v1911_v60 = vadd.f32 %v2551_v55, %v1898_v56  ;;  %v1741_v32 = vadd.f32 %v2550_v4, %v1740_v59  ;;  %v1901_v62 = vadd.f32 %v3095_v17, %v1746_v57 }
 0x98f   :  { %v3054_v29 = vpop.f32.mrf.mxu1 }
 0x990   :  { %v1900_v14 = vadd.f32 %v1869_v47, %v1741_v32  ;;  %v1756_v13 = vadd.f32 %v3054_v29, %v2550_v4  ;;  %3134 = vmatprep.mubr.f32.mxu1 %v1911_v60  ;;  %v1914_v1 = vadd.f32 %v2551_v55, %v1901_v62  ;;  %v2190_v62 = vld [vmem:[#allocation7 + $0x458] sm:$0xff]  ;;  %v2189_v29 = vld [vmem:[#allocation7 + $0x450] sm:$0xff] }
 0x991   :  { %v1750_v0 = vpop.f32.mrf.mxu1  ;;  %3135 = vmatmul.mubr.f32.vlgmr.msra.gmra.mxu1 %v1912_v61 }
 0x992   :  { %v1913_v12 = vadd.f32 %v2551_v55, %v1900_v14  ;;  %v1751_v18 = vadd.f32 %v2550_v4, %v1750_v0  ;;  %v1903_v2 = vadd.f32 %v3098_v54, %v1756_v13  ;;  %3191 = vmatpush3.msra.mxu1 %v2202_v35  ;;  %v2187_v14 = vld [vmem:[#allocation7 + $0x440] sm:$0xff]  ;;  %v2335_v0 = vld [vmem:[#allocation7 + $0x538] sm:$0xff] }
 0x993   :  { %v3057_v3 = vpop.f32.mrf.mxu1  ;;  %3192 = vmatprep.subr.mxu1 %v2201_v37  ;;  %v2336_v13 = vld [vmem:[#allocation7 + $0x540] sm:$0xff] }
 0x994   :  { %v1902_v5 = vadd.f32 %v1879_v20, %v1751_v18  ;;  %v1766_v9 = vadd.f32 %v3057_v3, %v2550_v4  ;;  %3137 = vmatprep.mubr.f32.mxu1 %v1913_v12  ;;  %v1916_v28 = vadd.f32 %v2551_v55, %v1903_v2  ;;  %3193 = vmatpush3.msra.mxu1 %v2201_v37  ;;  %v2188_v20 = vld [vmem:[#allocation7 + $0x448] sm:$0xff]  ;;  %v2334_v12 = vld [vmem:[#allocation7 + $0x530] sm:$0xff]  ;;  %v2331_v2 = vld [vmem:[#allocation7 + $0x518] sm:$0xff] }
 0x995   :  { %v1760_v58 = vpop.f32.mrf.mxu1  ;;  %3138 = vmatmul.mubr.f32.gmra.mxu1 %v1914_v1  ;;  %3194 = vmatprep.subr.mxu1 %v2200_v38  ;;  %v2333_v18 = vld [vmem:[#allocation7 + $0x528] sm:$0xff]  ;;  %v2332_v1 = vld [vmem:[#allocation7 + $0x520] sm:$0xff]  ;;  %v2330_v3 = vld [vmem:[#allocation7 + $0x510] sm:$0xff] }
 0x996   :  { %v1915_v7 = vadd.f32 %v2551_v55, %v1902_v5  ;;  %v1761_v40 = vadd.f32 %v2550_v4, %v1760_v58  ;;  %v1905_v6 = vadd.f32 %v3101_v63, %v1766_v9  ;;  %3195 = vmatpush3.msra.mxu1 %v2200_v38  ;;  %3234 = vmatprep.subr.mxu0 %v2336_v13  ;;  %v2329_v63 = vld [vmem:[#allocation7 + $0x508] sm:$0xff]  ;;  %v2328_v5 = vld [vmem:[#allocation7 + $0x500] sm:$0xff]  ;;  %v2327_v9 = vld [vmem:[#allocation7 + $0x4f8] sm:$0xff] }
 0x997   :  { %3196 = vmatprep.subr.mxu1 %v2199_v45  ;;  %v2326_v58 = vld [vmem:[#allocation7 + $0x4f0] sm:$0xff] }
 0x998   :  { %v1904_v26 = vadd.f32 %v1889_v21, %v1761_v40  ;;  %3140 = vmatprep.mubr.f32.mxu1 %v1915_v7  ;;  %v1918_v15 = vadd.f32 %v2551_v55, %v1905_v6  ;;  %3197 = vmatpush3.msra.mxu1 %v2199_v45  ;;  %v2325_v7 = vld [vmem:[#allocation7 + $0x4e8] sm:$0xff]  ;;  %v2553_v40 = vld [vmem:[#allocation7 + $0x438] ss:$0 sm:$0xff] }
 0x999   :  { %3141 = vmatmul.mubr.f32.gmra.mxu1 %v1916_v28  ;;  %3198 = vmatprep.subr.mxu1 %v2198_v46 }
 0x99a   :  { %v1917_v22 = vadd.f32 %v2551_v55, %v1904_v26  ;;  %3199 = vmatpush3.msra.mxu1 %v2198_v46 }
 0x99b   :  { %3200 = vmatprep.subr.mxu1 %v2197_v50 }
 0x99c   :  { %3143 = vmatprep.mubr.f32.mxu1 %v1917_v22  ;;  %3201 = vmatpush3.msra.mxu1 %v2197_v50 }
 0x99d   :  { %3144 = vmatmul.mubr.f32.gmra.mxu1 %v1918_v15  ;;  %3202 = vmatprep.subr.mxu1 %v2196_v10 }
 0x99e   :  { %3203 = vmatpush3.msra.mxu1 %v2196_v10 }
 0x99f   :  { %3204 = vmatprep.subr.mxu1 %v2195_v19 }
 0x9a0   :  { %3205 = vmatpush3.msra.mxu1 %v2195_v19 }
 0x9a1   :  { %3206 = vmatprep.subr.mxu1 %v2194_v36 }
 0x9a2   :  { %3207 = vmatpush3.msra.mxu1 %v2194_v36 }
 0x9a3   :  { %3208 = vmatprep.subr.mxu1 %v2193_v52 }
 0x9a4   :  { %3209 = vmatpush3.msra.mxu1 %v2193_v52 }
 0x9a5   :  { %3210 = vmatprep.subr.mxu1 %v2192_v39 }
 0x9a6   :  { %3211 = vmatpush3.msra.mxu1 %v2192_v39 }
 0x9a7   :  { %3212 = vmatprep.subr.mxu1 %v2191_v53 }
 0x9a8   :  { %3213 = vmatpush3.msra.mxu1 %v2191_v53 }
 0x9a9   :  { %3214 = vmatprep.subr.mxu1 %v2190_v62 }
 0x9aa   :  { %3215 = vmatpush3.msra.mxu1 %v2190_v62 }
 0x9ab   :  { %3216 = vmatprep.subr.mxu1 %v2189_v29 }
 0x9ac   :  { %3217 = vmatpush3.msra.mxu1 %v2189_v29 }
 0x9ad   :  { %3218 = vmatprep.subr.mxu1 %v2188_v20 }
 0x9ae   :  { %3219 = vmatpush3.msra.mxu1 %v2188_v20 }
 0x9af   :  { %3220 = vmatprep.subr.mxu1 %v2187_v14 }
 0x9b0   :  { %3221 = vmatpush3.msra.mxu1 %v2187_v14 }
 0xa51   :  { %v3136_v41 = vpop.f32.mrf.mxu1 }
 0xa52   :  { %v2012_v16 = vadd.f32 %v3136_v41, %v2552_v24 }
 0xa53   :  { %v2006_v42 = vpop.f32.mrf.mxu1 }
 0xa54   :  { %v2007_v25 = vadd.f32 %v2552_v24, %v2006_v42  ;;  %v2046_v11 = vmax.f32 %v2012_v16, 0.0  ;;  %v2324_v16 = vld [vmem:[#allocation7 + $0x4e0] sm:$0xff]  ;;  %v2323_v42 = vld [vmem:[#allocation7 + $0x4d8] sm:$0xff] }
 0xa55   :  { %v3139_v43 = vpop.f32.mrf.mxu1 }
 0xa56   :  { %v2045_v27 = vmax.f32 %v2007_v25, 0.0  ;;  %v2022_v17 = vadd.f32 %v3139_v43, %v2552_v24  ;;  %v2322_v25 = vld [vmem:[#allocation7 + $0x4d0] sm:$0xff]  ;;  %v2321_v43 = vld [vmem:[#allocation7 + $0x4c8] sm:$0xff] }
 0xa57   :  { %v2016_v4 = vpop.f32.mrf.mxu1 }
 0xa58   :  { %v2017_v44 = vadd.f32 %v2552_v24, %v2016_v4  ;;  %3178 = vmatprep.mubr.f32.mxu0 %v2045_v27  ;;  %v2048_v49 = vmax.f32 %v2022_v17, 0.0  ;;  %v2554_v27 = vld [vmem:[#allocation7 + $0x4c0] ss:$0 sm:$0xff] }
 0xa59   :  { %v3142_v47 = vpop.f32.mrf.mxu1  ;;  %3179 = vmatmul.mubr.f32.vlgmr.msra.gmra.mxu0 %v2046_v11 }
 0xa5a   :  { %v2047_v48 = vmax.f32 %v2017_v44, 0.0  ;;  %v2032_v8 = vadd.f32 %v3142_v47, %v2552_v24  ;;  %3235 = vmatpush3.msra.mxu0 %v2336_v13 }
 0xa5b   :  { %v2026_v23 = vpop.f32.mrf.mxu1  ;;  %3236 = vmatprep.subr.mxu0 %v2335_v0 }
 0xa5c   :  { %v2027_v51 = vadd.f32 %v2552_v24, %v2026_v23  ;;  %3181 = vmatprep.mubr.f32.mxu0 %v2047_v48  ;;  %v2050_v56 = vmax.f32 %v2032_v8, 0.0  ;;  %3237 = vmatpush3.msra.mxu0 %v2335_v0 }
 0xa5d   :  { %v3145_v54 = vpop.f32.mrf.mxu1  ;;  %3182 = vmatmul.mubr.f32.gmra.mxu0 %v2048_v49  ;;  %3238 = vmatprep.subr.mxu0 %v2334_v12 }
 0xa5e   :  { %v2049_v55 = vmax.f32 %v2027_v51, 0.0  ;;  %v2042_v57 = vadd.f32 %v3145_v54, %v2552_v24  ;;  %3239 = vmatpush3.msra.mxu0 %v2334_v12  ;;  %v2555_v12 = vld [vmem:[#allocation7 + $0x548] ss:$0 sm:$0xff] }
 0xa5f   :  { %v2036_v59 = vpop.f32.mrf.mxu1  ;;  %3240 = vmatprep.subr.mxu0 %v2333_v18 }
 0xa60   :  { %v2037_v60 = vadd.f32 %v2552_v24, %v2036_v59  ;;  %3184 = vmatprep.mubr.f32.mxu0 %v2049_v55  ;;  %v2052_v61 = vmax.f32 %v2042_v57, 0.0  ;;  %3241 = vmatpush3.msra.mxu0 %v2333_v18 }
 0xa61   :  { %3185 = vmatmul.mubr.f32.gmra.mxu0 %v2050_v56  ;;  %3242 = vmatprep.subr.mxu0 %v2332_v1 }
 0xa62   :  { %v2051_v32 = vmax.f32 %v2037_v60, 0.0  ;;  %3243 = vmatpush3.msra.mxu0 %v2332_v1 }
 0xa63   :  { %3244 = vmatprep.subr.mxu0 %v2331_v2 }
 0xa64   :  { %3187 = vmatprep.mubr.f32.mxu0 %v2051_v32  ;;  %3245 = vmatpush3.msra.mxu0 %v2331_v2 }
 0xa65   :  { %3188 = vmatmul.mubr.f32.gmra.mxu0 %v2052_v61  ;;  %3246 = vmatprep.subr.mxu0 %v2330_v3 }
 0xa66   :  { %3247 = vmatpush3.msra.mxu0 %v2330_v3 }
 0xa67   :  { %3248 = vmatprep.subr.mxu0 %v2329_v63 }
 0xa68   :  { %3249 = vmatpush3.msra.mxu0 %v2329_v63 }
 0xa69   :  { %3250 = vmatprep.subr.mxu0 %v2328_v5 }
 0xa6a   :  { %3251 = vmatpush3.msra.mxu0 %v2328_v5 }
 0xa6b   :  { %3252 = vmatprep.subr.mxu0 %v2327_v9 }
 0xa6c   :  { %3253 = vmatpush3.msra.mxu0 %v2327_v9 }
 0xa6d   :  { %3254 = vmatprep.subr.mxu0 %v2326_v58 }
 0xa6e   :  { %3255 = vmatpush3.msra.mxu0 %v2326_v58 }
 0xa6f   :  { %3256 = vmatprep.subr.mxu0 %v2325_v7 }
 0xa70   :  { %3257 = vmatpush3.msra.mxu0 %v2325_v7 }
 0xa71   :  { %3258 = vmatprep.subr.mxu0 %v2324_v16 }
 0xa72   :  { %3259 = vmatpush3.msra.mxu0 %v2324_v16 }
 0xa73   :  { %3260 = vmatprep.subr.mxu0 %v2323_v42 }
 0xa74   :  { %3261 = vmatpush3.msra.mxu0 %v2323_v42 }
 0xa75   :  { %3262 = vmatprep.subr.mxu0 %v2322_v25 }
 0xa76   :  { %3263 = vmatpush3.msra.mxu0 %v2322_v25 }
 0xa77   :  { %3264 = vmatprep.subr.mxu0 %v2321_v43 }
 0xa78   :  { %3265 = vmatpush3.msra.mxu0 %v2321_v43 }
 0xb19   :  { %v3180_v28 = vpop.f32.mrf.mxu0 }
 0xb1a   :  { %v2146_v6 = vadd.f32 %v3180_v28, %v2553_v40 }
 0xb1b   :  { %v2140_v21 = vpop.f32.mrf.mxu0 }
 0xb1c   :  { %v2141_v26 = vadd.f32 %v2553_v40, %v2140_v21  ;;  %v2180_v30 = vmax.f32 %v2146_v6, 0.0 }
 0xb1d   :  { %v3183_v22 = vpop.f32.mrf.mxu0 }
 0xb1e   :  { %v2179_v15 = vmax.f32 %v2141_v26, 0.0  ;;  %v2156_v31 = vadd.f32 %v3183_v22, %v2553_v40 }
 0xb1f   :  { %v2150_v33 = vpop.f32.mrf.mxu0 }
 0xb20   :  { %v2151_v34 = vadd.f32 %v2553_v40, %v2150_v33  ;;  %3222 = vmatprep.mubr.f32.mxu1 %v2179_v15  ;;  %v2182_v38 = vmax.f32 %v2156_v31, 0.0 }
 0xb21   :  { %v3186_v35 = vpop.f32.mrf.mxu0  ;;  %3223 = vmatmul.mubr.f32.vlgmr.msra.gmra.mxu1 %v2180_v30 }
 0xb22   :  { %v2181_v37 = vmax.f32 %v2151_v34, 0.0  ;;  %v2166_v45 = vadd.f32 %v3186_v35, %v2553_v40 }
 0xb23   :  { %v2160_v46 = vpop.f32.mrf.mxu0 }
 0xb24   :  { %v2161_v50 = vadd.f32 %v2553_v40, %v2160_v46  ;;  %3225 = vmatprep.mubr.f32.mxu1 %v2181_v37  ;;  %v2184_v36 = vmax.f32 %v2166_v45, 0.0 }
 0xb25   :  { %v3189_v10 = vpop.f32.mrf.mxu0  ;;  %3226 = vmatmul.mubr.f32.gmra.mxu1 %v2182_v38 }
 0xb26   :  { %v2183_v19 = vmax.f32 %v2161_v50, 0.0  ;;  %v2176_v52 = vadd.f32 %v3189_v10, %v2553_v40 }
 0xb27   :  { %v2170_v39 = vpop.f32.mrf.mxu0 }
 0xb28   :  { %v2171_v53 = vadd.f32 %v2553_v40, %v2170_v39  ;;  %3228 = vmatprep.mubr.f32.mxu1 %v2183_v19  ;;  %v2186_v41 = vmax.f32 %v2176_v52, 0.0 }
 0xb29   :  { %3229 = vmatmul.mubr.f32.gmra.mxu1 %v2184_v36 }
 0xb2a   :  { %v2185_v24 = vmax.f32 %v2171_v53, 0.0 }
 0xb2c   :  { %3231 = vmatprep.mubr.f32.mxu1 %v2185_v24 }
 0xb2d   :  { %3232 = vmatmul.mubr.f32.gmra.mxu1 %v2186_v41 }
 0xbe1   :  { %v3224_v11 = vpop.f32.mrf.mxu1 }
 0xbe2   :  { %v2280_v17 = vadd.f32 %v3224_v11, %v2554_v27 }
 0xbe3   :  { %v2274_v4 = vpop.f32.mrf.mxu1 }
 0xbe4   :  { %v2275_v44 = vadd.f32 %v2554_v27, %v2274_v4  ;;  %v2314_v49 = vmax.f32 %v2280_v17, 0.0 }
 0xbe5   :  { %v3227_v47 = vpop.f32.mrf.mxu1 }
 0xbe6   :  { %v2313_v48 = vmax.f32 %v2275_v44, 0.0  ;;  %v2290_v8 = vadd.f32 %v3227_v47, %v2554_v27 }
 0xbe7   :  { %v2284_v23 = vpop.f32.mrf.mxu1 }
 0xbe8   :  { %v2285_v51 = vadd.f32 %v2554_v27, %v2284_v23  ;;  %3266 = vmatprep.mubr.f32.mxu0 %v2313_v48  ;;  %v2316_v56 = vmax.f32 %v2290_v8, 0.0 }
 0xbe9   :  { %v3230_v54 = vpop.f32.mrf.mxu1  ;;  %3267 = vmatmul.mubr.f32.vlgmr.msra.gmra.mxu0 %v2314_v49 }
 0xbea   :  { %v2315_v55 = vmax.f32 %v2285_v51, 0.0  ;;  %v2300_v57 = vadd.f32 %v3230_v54, %v2554_v27 }
 0xbeb   :  { %v2294_v59 = vpop.f32.mrf.mxu1 }
 0xbec   :  { %v2295_v60 = vadd.f32 %v2554_v27, %v2294_v59  ;;  %3269 = vmatprep.mubr.f32.mxu0 %v2315_v55  ;;  %v2318_v62 = vmax.f32 %v2300_v57, 0.0 }
 0xbed   :  { %v3233_v32 = vpop.f32.mrf.mxu1  ;;  %3270 = vmatmul.mubr.f32.gmra.mxu0 %v2316_v56 }
 0xbee   :  { %v2317_v61 = vmax.f32 %v2295_v60, 0.0  ;;  %v2310_v29 = vadd.f32 %v3233_v32, %v2554_v27 }
 0xbef   :  { %v2304_v20 = vpop.f32.mrf.mxu1 }
 0xbf0   :  { %v2305_v14 = vadd.f32 %v2554_v27, %v2304_v20  ;;  %3272 = vmatprep.mubr.f32.mxu0 %v2317_v61  ;;  %v2320_v0 = vmax.f32 %v2310_v29, 0.0 }
 0xbf1   :  { %3273 = vmatmul.mubr.f32.gmra.mxu0 %v2318_v62 }
 0xbf2   :  { %v2319_v13 = vmax.f32 %v2305_v14, 0.0 }
 0xbf4   :  { %3275 = vmatprep.mubr.f32.mxu0 %v2319_v13 }
 0xbf5   :  { %3276 = vmatmul.mubr.f32.gmra.mxu0 %v2320_v0 }
 0xca9   :  { %v3268_v18 = vpop.f32.mrf.mxu0 }
 0xcaa   :  { %v2414_v1 = vadd.f32 %v3268_v18, %v2555_v12 }
 0xcab   :  { %v2408_v2 = vpop.f32.mrf.mxu0 }
 0xcac   :  { %2448 = vst [vmem:[#allocation8 + $0x8] sm:$0xff] %v2414_v1  ;;  %v2409_v3 = vadd.f32 %v2555_v12, %v2408_v2 }
 0xcad   :  { %v3271_v63 = vpop.f32.mrf.mxu0 }
 0xcae   :  { %2447 = vst [vmem:[#allocation8] sm:$0xff] %v2409_v3  ;;  %v2424_v5 = vadd.f32 %v3271_v63, %v2555_v12 }
 0xcaf   :  { %v2418_v9 = vpop.f32.mrf.mxu0 }
 0xcb0   :  { %2450 = vst [vmem:[#allocation8 + $0x18] sm:$0xff] %v2424_v5  ;;  %v2419_v58 = vadd.f32 %v2555_v12, %v2418_v9 }
 0xcb1   :  { %v3274_v7 = vpop.f32.mrf.mxu0 }
 0xcb2   :  { %2449 = vst [vmem:[#allocation8 + $0x10] sm:$0xff] %v2419_v58  ;;  %v2434_v40 = vadd.f32 %v3274_v7, %v2555_v12 }
 0xcb3   :  { %v2428_v28 = vpop.f32.mrf.mxu0 }
 0xcb4   :  { %2452 = vst [vmem:[#allocation8 + $0x28] sm:$0xff] %v2434_v40  ;;  %v2429_v6 = vadd.f32 %v2555_v12, %v2428_v28 }
 0xcb5   :  { %v3277_v21 = vpop.f32.mrf.mxu0 }
 0xcb6   :  { %2451 = vst [vmem:[#allocation8 + $0x20] sm:$0xff] %v2429_v6  ;;  %v2444_v26 = vadd.f32 %v3277_v21, %v2555_v12 }
 0xcb7   :  { %v2438_v22 = vpop.f32.mrf.mxu0 }
 0xcb8   :  { %2454 = vst [vmem:[#allocation8 + $0x38] sm:$0xff] %v2444_v26  ;;  %v2439_v15 = vadd.f32 %v2555_v12, %v2438_v22 }
 0xcba   :  { %2453 = vst [vmem:[#allocation8 + $0x30] sm:$0xff] %v2439_v15 }
 0xcbb   :  { %3393 = shalt.err (!%p3390_p5)
}
 0xcbc   :  { %2466 = dma.vmem_to_hbm [thread:$0]  %s2461_s29, 1024, %s3966_s3, [#allocation4], %s3410_s17, %s3410_s17, %s3411_s18  }
 0xcbd   :  { %3406 = dma.done.wait [#allocation4], 1024  }
 0xcbe   :  { %3407 = vsyncadd [#allocation4], 4294966272 }
 0xcbf   :  { %2470 = vsyncpa [#allocation3], 1 }
 0xcc0   :  { %2471 = vsyncpa [#allocation6], 1 }
 0xcc1   :  { %2472 = vsyncpa [#allocation4], 1 }

</bundles_post_ra>
